<compile_context>
chip_gen: v7x
topology: tpu7x:2x2x1
jax: 0.10.0
libtpu: 0.0.40
codegen_flags: <defaults>
</compile_context>

<pallas_src>
import functools

import jax
import jax.numpy as jnp
from jax import lax
from jax.experimental import pallas as pl
from jax.experimental.pallas import tpu as pltpu

N_HIDDEN = 8          # number of hidden Linear layers
HIDDEN = 10           # hidden width
B_INIT = -0.2
BN_EPS = 1e-5         # PyTorch BatchNorm1d default eps
LANES = 128           # lane-dense feature axis
SLOT = 16             # lanes reserved per layer inside the packed output slabs


def _bn(x):
    """BatchNorm1d (training mode, gamma=1, beta=0) over the batch axis.

    One-pass form: mean and mean-of-squares are independent sublane reductions;
    eps guards the E[x^2] - mu^2 cancellation (zero padded lanes stay zero).
    """
    mu = jnp.mean(x, axis=0, keepdims=True)
    ex2 = jnp.mean(x * x, axis=0, keepdims=True)
    var = ex2 - mu * mu
    return (x - mu) * lax.rsqrt(var + BN_EPS)


def net_kernel(do_bn, x_ref, w_ref, b_ref, head_ref, pre_ref, acts_ref, *rest):
    x = x_ref[...]                                # (tile, 1) f32
    h0 = _bn(x) if do_bn else x
    if do_bn:
        rest[0][...] = h0                         # layer_input[0] (bn'd input)

    # ---- layer 0 (K=1): rank-1 broadcast multiply-add on the VPU ------------
    w0_row = w_ref[0][0:1, :]                     # (1, 128): data in lanes 0..9
    pre = h0 * w0_row + b_ref[0]                  # (tile, 128)
    h = jnp.tanh(_bn(pre) if do_bn else pre)
    pre_pack = pre                                # layer 0 -> lanes 0..9
    acts_pack = h

    # ---- layers 1..7: (tile,128) @ (128,128) MXU dots ------------------------
    # Layer i's weight block is packed at rows 16*(i-1).., cols 16*i.., so the
    # dot reads h from the previous layer's lane region and writes its result
    # directly into its own 16-lane region (all other rows/cols are zero).
    for i in range(1, N_HIDDEN):
        pre = jnp.dot(h, w_ref[i], preferred_element_type=jnp.float32) + b_ref[i]
        h = jnp.tanh(_bn(pre) if do_bn else pre)
        pre_pack = pre_pack + pre                 # disjoint lane regions
        acts_pack = acts_pack + h

    pre_ref[...] = pre_pack                       # one dense unmasked (tile,128) store
    acts_ref[...] = acts_pack

    # ---- predict head (N=1): VPU multiply + XLU lane reduction ---------------
    wp_row = w_ref[N_HIDDEN][0:1, :]              # data in lanes 112..121
    bp = b_ref[N_HIDDEN][0:1, 0:1]                # (1, 1)
    head_ref[...] = jnp.sum(h * wp_row, axis=-1, keepdims=True) + bp


def init_params(key):
    """Torch-layout params mimicking _set_init: W ~ N(0, 0.1), b = B_INIT."""
    ks = jax.random.split(key, N_HIDDEN + 1)
    layers = []
    for i in range(N_HIDDEN):
        in_f = 1 if i == 0 else HIDDEN
        W = 0.1 * jax.random.normal(ks[i], (HIDDEN, in_f), jnp.float32)   # (out, in)
        b = jnp.full((HIDDEN,), B_INIT, jnp.float32)
        layers.append((W, b))
    Wp = 0.1 * jax.random.normal(ks[N_HIDDEN], (1, HIDDEN), jnp.float32)  # (1, 10)
    bp = jnp.full((1,), B_INIT, jnp.float32)
    layers.append((Wp, bp))
    return layers


def pack_params(params):
    """Pack into lane-placed slabs: w (9,128,128), b (9,1,128).

    Layer i (1..7): weight.T at rows 16*(i-1)..+10, cols 16*i..+10; bias at
    lanes 16*i..+10.  Layer 0: row 0, cols 0..9 (used on the VPU path).
    Predict head (slot 8): row 0, cols 112..121 (matches layer-7 lane region);
    bias in lane 0.
    """
    w = jnp.zeros((N_HIDDEN + 1, LANES, LANES), jnp.float32)
    b = jnp.zeros((N_HIDDEN + 1, 1, LANES), jnp.float32)
    for i in range(N_HIDDEN):
        Wi, bi = params[i]                         # Wi: (10, in)
        r0 = 0 if i == 0 else SLOT * (i - 1)
        c0 = SLOT * i
        w = w.at[i, r0:r0 + Wi.shape[1], c0:c0 + HIDDEN].set(Wi.T)
        b = b.at[i, 0, c0:c0 + HIDDEN].set(bi)
    Wp, bp = params[N_HIDDEN]
    c_last = SLOT * (N_HIDDEN - 1)
    w = w.at[N_HIDDEN, 0, c_last:c_last + HIDDEN].set(Wp[0])
    b = b.at[N_HIDDEN, 0, 0].set(bp[0])
    return w, b


def net_forward(x, packed, do_bn=False, tile=128):
    """Returns (out, layer_input, pre_activation) like Net.forward."""
    n = x.shape[0]
    w, b = packed
    if do_bn:
        tile = n          # BatchNorm needs full-batch statistics in one block
    tile = min(tile, n)
    assert n % tile == 0 and tile % 8 == 0, "row count must tile by a multiple of 8"
    grid = (n // tile,)

    out_shape = [
        jax.ShapeDtypeStruct((n, 1), jnp.float32),       # head (predict output)
        jax.ShapeDtypeStruct((n, LANES), jnp.float32),   # packed pre-activations
        jax.ShapeDtypeStruct((n, LANES), jnp.float32),   # packed activations
    ]
    out_specs = [
        pl.BlockSpec((tile, 1), lambda i: (i, 0)),
        pl.BlockSpec((tile, LANES), lambda i: (i, 0)),
        pl.BlockSpec((tile, LANES), lambda i: (i, 0)),
    ]
    if do_bn:
        out_shape.append(jax.ShapeDtypeStruct((n, 1), jnp.float32))   # bn'd input
        out_specs.append(pl.BlockSpec((tile, 1), lambda i: (i, 0)))

    results = pl.pallas_call(
        functools.partial(net_kernel, do_bn),
        out_shape=tuple(out_shape),
        grid_spec=pltpu.PrefetchScalarGridSpec(
            num_scalar_prefetch=0,
            grid=grid,
            in_specs=[
                pl.BlockSpec((tile, 1), lambda i: (i, 0)),
                # constant index_map: weight/bias slabs stay VMEM-resident
                pl.BlockSpec((N_HIDDEN + 1, LANES, LANES), lambda i: (0, 0, 0)),
                pl.BlockSpec((N_HIDDEN + 1, 1, LANES), lambda i: (0, 0, 0)),
            ],
            out_specs=tuple(out_specs),
        ),
        compiler_params=pltpu.CompilerParams(
            dimension_semantics=("parallel",)),
    )(x, w, b)

    head, pre_packed, acts_packed = results[0], results[1], results[2]
    first = results[3] if do_bn else x
    layer_input = [first] + [acts_packed[:, SLOT * i:SLOT * i + HIDDEN]
                             for i in range(N_HIDDEN)]
    pre_activation = [x] + [pre_packed[:, SLOT * i:SLOT * i + HIDDEN]
                            for i in range(N_HIDDEN)]
    return head, layer_input, pre_activation


def net_forward_ref(x, params, do_bn=False):
    """Pure-JAX reference (HIGHEST precision dots; DEFAULT would demote to bf16)."""
    hi = lax.Precision.HIGHEST
    pre_activation = [x]
    h = _bn(x) if do_bn else x
    layer_input = [h]
    for i in range(N_HIDDEN):
        W, bvec = params[i]
        pre = jnp.dot(h, W.T, precision=hi) + bvec
        pre_activation.append(pre)
        h = jnp.tanh(_bn(pre) if do_bn else pre)
        layer_input.append(h)
    Wp, bp = params[N_HIDDEN]
    out = jnp.dot(h, Wp.T, precision=hi) + bp
    return out, layer_input, pre_activation


if __name__ == "__main__":
    key = jax.random.PRNGKey(0)
    pkey, xkey = jax.random.split(key)
    params = init_params(pkey)
    packed = pack_params(params)

    # Small batch of scalar inputs spread over the same range as the script.
    N = 512
    x = jnp.linspace(-7.0, 10.0, N, dtype=jnp.float32)[:, None]     # (N, 1)
    x = x + 0.01 * jax.random.normal(xkey, x.shape, jnp.float32)

    TOL = 2e-3   # margin for tanh/rsqrt impl differences compounded through 8 layers
    ok = True
    for do_bn in (False, True):
        out, layer_input, pre_activation = net_forward(x, packed, do_bn=do_bn, tile=128)
        jax.block_until_ready(out)
        r_out, r_li, r_pa = net_forward_ref(x, params, do_bn=do_bn)
        ok &= bool(jnp.allclose(out, r_out, atol=TOL, rtol=TOL))
        for a, r in zip(layer_input, r_li):
            ok &= bool(jnp.allclose(a, r, atol=TOL, rtol=TOL))
        for a, r in zip(pre_activation, r_pa):
            ok &= bool(jnp.allclose(a, r, atol=TOL, rtol=TOL))

    print("KERNEL_OK" if ok else "MISMATCH")
</pallas_src>

<mosaic_0001>
module attributes {stable_mosaic.version = 11 : i64} {
  func.func @net_kernel(%arg0: i32, %arg1: memref<128x1xf32, #tpu.memory_space<vmem>>, %arg2: memref<9x128x128xf32, #tpu.memory_space<vmem>>, %arg3: memref<9x1x128xf32, #tpu.memory_space<vmem>>, %arg4: memref<128x1xf32, #tpu.memory_space<vmem>>, %arg5: memref<128x128xf32, #tpu.memory_space<vmem>>, %arg6: memref<128x128xf32, #tpu.memory_space<vmem>>) attributes {dimension_semantics = [#tpu.dimension_semantics<parallel>], iteration_bounds = array<i64: 4>, scalar_prefetch = 0 : i64, scratch_operands = 0 : i64, tpu.core_type = #tpu.core_type<tc>, window_params = [{transform_indices = @transform_0, window_bounds = array<i64: 128, 1>}, {pipeline_mode = #tpu.pipeline_mode<synchronous>, transform_indices = @transform_1, window_bounds = array<i64: 9, 128, 128>}, {pipeline_mode = #tpu.pipeline_mode<synchronous>, transform_indices = @transform_2, window_bounds = array<i64: 9, 1, 128>}, {transform_indices = @transform_3, window_bounds = array<i64: 128, 1>}, {transform_indices = @transform_4, window_bounds = array<i64: 128, 128>}, {transform_indices = @transform_5, window_bounds = array<i64: 128, 128>}]} {
    %c0 = arith.constant 0 : index
    %c0_0 = arith.constant 0 : index
    %0 = vector.load %arg1[%c0, %c0_0] : memref<128x1xf32, #tpu.memory_space<vmem>>, vector<128x1xf32>
    %c0_1 = arith.constant 0 : index
    %c0_2 = arith.constant 0 : index
    %c0_3 = arith.constant 0 : index
    %1 = vector.load %arg2[%c0_1, %c0_2, %c0_3] : memref<9x128x128xf32, #tpu.memory_space<vmem>>, vector<1x128x128xf32>
    %2 = vector.shape_cast %1 : vector<1x128x128xf32> to vector<128x128xf32>
    %3 = vector.extract_strided_slice %2 {offsets = [0, 0], sizes = [1, 128], strides = [1, 1]} : vector<128x128xf32> to vector<1x128xf32>
    %4 = vector.broadcast %0 : vector<128x1xf32> to vector<128x128xf32>
    %5 = vector.broadcast %3 : vector<1x128xf32> to vector<128x128xf32>
    %6 = arith.mulf %4, %5 : vector<128x128xf32>
    %c0_4 = arith.constant 0 : index
    %c0_5 = arith.constant 0 : index
    %c0_6 = arith.constant 0 : index
    %7 = vector.load %arg3[%c0_4, %c0_5, %c0_6] : memref<9x1x128xf32, #tpu.memory_space<vmem>>, vector<1x1x128xf32>
    %8 = vector.shape_cast %7 : vector<1x1x128xf32> to vector<1x128xf32>
    %9 = vector.broadcast %8 : vector<1x128xf32> to vector<128x128xf32>
    %10 = arith.addf %6, %9 : vector<128x128xf32>
    %11 = math.tanh %10 : vector<128x128xf32>
    %c1 = arith.constant 1 : index
    %c0_7 = arith.constant 0 : index
    %c0_8 = arith.constant 0 : index
    %12 = vector.load %arg2[%c1, %c0_7, %c0_8] : memref<9x128x128xf32, #tpu.memory_space<vmem>>, vector<1x128x128xf32>
    %13 = vector.shape_cast %12 : vector<1x128x128xf32> to vector<128x128xf32>
    %cst = arith.constant dense<0.000000e+00> : vector<128x128xf32>
    %14 = tpu.matmul %11, %13, %cst {dimension_numbers = #tpu.dot_dimension_numbers<[1], [0], [0], [1], [0, 0, 1, 1], [], []>} : vector<128x128xf32>, vector<128x128xf32>, vector<128x128xf32> -> vector<128x128xf32>
    %c1_9 = arith.constant 1 : index
    %c0_10 = arith.constant 0 : index
    %c0_11 = arith.constant 0 : index
    %15 = vector.load %arg3[%c1_9, %c0_10, %c0_11] : memref<9x1x128xf32, #tpu.memory_space<vmem>>, vector<1x1x128xf32>
    %16 = vector.shape_cast %15 : vector<1x1x128xf32> to vector<1x128xf32>
    %17 = vector.broadcast %16 : vector<1x128xf32> to vector<128x128xf32>
    %18 = arith.addf %14, %17 : vector<128x128xf32>
    %19 = math.tanh %18 : vector<128x128xf32>
    %20 = arith.addf %10, %18 : vector<128x128xf32>
    %21 = arith.addf %11, %19 : vector<128x128xf32>
    %c2 = arith.constant 2 : index
    %c0_12 = arith.constant 0 : index
    %c0_13 = arith.constant 0 : index
    %22 = vector.load %arg2[%c2, %c0_12, %c0_13] : memref<9x128x128xf32, #tpu.memory_space<vmem>>, vector<1x128x128xf32>
    %23 = vector.shape_cast %22 : vector<1x128x128xf32> to vector<128x128xf32>
    %cst_14 = arith.constant dense<0.000000e+00> : vector<128x128xf32>
    %24 = tpu.matmul %19, %23, %cst_14 {dimension_numbers = #tpu.dot_dimension_numbers<[1], [0], [0], [1], [0, 0, 1, 1], [], []>} : vector<128x128xf32>, vector<128x128xf32>, vector<128x128xf32> -> vector<128x128xf32>
    %c2_15 = arith.constant 2 : index
    %c0_16 = arith.constant 0 : index
    %c0_17 = arith.constant 0 : index
    %25 = vector.load %arg3[%c2_15, %c0_16, %c0_17] : memref<9x1x128xf32, #tpu.memory_space<vmem>>, vector<1x1x128xf32>
    %26 = vector.shape_cast %25 : vector<1x1x128xf32> to vector<1x128xf32>
    %27 = vector.broadcast %26 : vector<1x128xf32> to vector<128x128xf32>
    %28 = arith.addf %24, %27 : vector<128x128xf32>
    %29 = math.tanh %28 : vector<128x128xf32>
    %30 = arith.addf %20, %28 : vector<128x128xf32>
    %31 = arith.addf %21, %29 : vector<128x128xf32>
    %c3 = arith.constant 3 : index
    %c0_18 = arith.constant 0 : index
    %c0_19 = arith.constant 0 : index
    %32 = vector.load %arg2[%c3, %c0_18, %c0_19] : memref<9x128x128xf32, #tpu.memory_space<vmem>>, vector<1x128x128xf32>
    %33 = vector.shape_cast %32 : vector<1x128x128xf32> to vector<128x128xf32>
    %cst_20 = arith.constant dense<0.000000e+00> : vector<128x128xf32>
    %34 = tpu.matmul %29, %33, %cst_20 {dimension_numbers = #tpu.dot_dimension_numbers<[1], [0], [0], [1], [0, 0, 1, 1], [], []>} : vector<128x128xf32>, vector<128x128xf32>, vector<128x128xf32> -> vector<128x128xf32>
    %c3_21 = arith.constant 3 : index
    %c0_22 = arith.constant 0 : index
    %c0_23 = arith.constant 0 : index
    %35 = vector.load %arg3[%c3_21, %c0_22, %c0_23] : memref<9x1x128xf32, #tpu.memory_space<vmem>>, vector<1x1x128xf32>
    %36 = vector.shape_cast %35 : vector<1x1x128xf32> to vector<1x128xf32>
    %37 = vector.broadcast %36 : vector<1x128xf32> to vector<128x128xf32>
    %38 = arith.addf %34, %37 : vector<128x128xf32>
    %39 = math.tanh %38 : vector<128x128xf32>
    %40 = arith.addf %30, %38 : vector<128x128xf32>
    %41 = arith.addf %31, %39 : vector<128x128xf32>
    %c4 = arith.constant 4 : index
    %c0_24 = arith.constant 0 : index
    %c0_25 = arith.constant 0 : index
    %42 = vector.load %arg2[%c4, %c0_24, %c0_25] : memref<9x128x128xf32, #tpu.memory_space<vmem>>, vector<1x128x128xf32>
    %43 = vector.shape_cast %42 : vector<1x128x128xf32> to vector<128x128xf32>
    %cst_26 = arith.constant dense<0.000000e+00> : vector<128x128xf32>
    %44 = tpu.matmul %39, %43, %cst_26 {dimension_numbers = #tpu.dot_dimension_numbers<[1], [0], [0], [1], [0, 0, 1, 1], [], []>} : vector<128x128xf32>, vector<128x128xf32>, vector<128x128xf32> -> vector<128x128xf32>
    %c4_27 = arith.constant 4 : index
    %c0_28 = arith.constant 0 : index
    %c0_29 = arith.constant 0 : index
    %45 = vector.load %arg3[%c4_27, %c0_28, %c0_29] : memref<9x1x128xf32, #tpu.memory_space<vmem>>, vector<1x1x128xf32>
    %46 = vector.shape_cast %45 : vector<1x1x128xf32> to vector<1x128xf32>
    %47 = vector.broadcast %46 : vector<1x128xf32> to vector<128x128xf32>
    %48 = arith.addf %44, %47 : vector<128x128xf32>
    %49 = math.tanh %48 : vector<128x128xf32>
    %50 = arith.addf %40, %48 : vector<128x128xf32>
    %51 = arith.addf %41, %49 : vector<128x128xf32>
    %c5 = arith.constant 5 : index
    %c0_30 = arith.constant 0 : index
    %c0_31 = arith.constant 0 : index
    %52 = vector.load %arg2[%c5, %c0_30, %c0_31] : memref<9x128x128xf32, #tpu.memory_space<vmem>>, vector<1x128x128xf32>
    %53 = vector.shape_cast %52 : vector<1x128x128xf32> to vector<128x128xf32>
    %cst_32 = arith.constant dense<0.000000e+00> : vector<128x128xf32>
    %54 = tpu.matmul %49, %53, %cst_32 {dimension_numbers = #tpu.dot_dimension_numbers<[1], [0], [0], [1], [0, 0, 1, 1], [], []>} : vector<128x128xf32>, vector<128x128xf32>, vector<128x128xf32> -> vector<128x128xf32>
    %c5_33 = arith.constant 5 : index
    %c0_34 = arith.constant 0 : index
    %c0_35 = arith.constant 0 : index
    %55 = vector.load %arg3[%c5_33, %c0_34, %c0_35] : memref<9x1x128xf32, #tpu.memory_space<vmem>>, vector<1x1x128xf32>
    %56 = vector.shape_cast %55 : vector<1x1x128xf32> to vector<1x128xf32>
    %57 = vector.broadcast %56 : vector<1x128xf32> to vector<128x128xf32>
    %58 = arith.addf %54, %57 : vector<128x128xf32>
    %59 = math.tanh %58 : vector<128x128xf32>
    %60 = arith.addf %50, %58 : vector<128x128xf32>
    %61 = arith.addf %51, %59 : vector<128x128xf32>
    %c6 = arith.constant 6 : index
    %c0_36 = arith.constant 0 : index
    %c0_37 = arith.constant 0 : index
    %62 = vector.load %arg2[%c6, %c0_36, %c0_37] : memref<9x128x128xf32, #tpu.memory_space<vmem>>, vector<1x128x128xf32>
    %63 = vector.shape_cast %62 : vector<1x128x128xf32> to vector<128x128xf32>
    %cst_38 = arith.constant dense<0.000000e+00> : vector<128x128xf32>
    %64 = tpu.matmul %59, %63, %cst_38 {dimension_numbers = #tpu.dot_dimension_numbers<[1], [0], [0], [1], [0, 0, 1, 1], [], []>} : vector<128x128xf32>, vector<128x128xf32>, vector<128x128xf32> -> vector<128x128xf32>
    %c6_39 = arith.constant 6 : index
    %c0_40 = arith.constant 0 : index
    %c0_41 = arith.constant 0 : index
    %65 = vector.load %arg3[%c6_39, %c0_40, %c0_41] : memref<9x1x128xf32, #tpu.memory_space<vmem>>, vector<1x1x128xf32>
    %66 = vector.shape_cast %65 : vector<1x1x128xf32> to vector<1x128xf32>
    %67 = vector.broadcast %66 : vector<1x128xf32> to vector<128x128xf32>
    %68 = arith.addf %64, %67 : vector<128x128xf32>
    %69 = math.tanh %68 : vector<128x128xf32>
    %70 = arith.addf %60, %68 : vector<128x128xf32>
    %71 = arith.addf %61, %69 : vector<128x128xf32>
    %c7 = arith.constant 7 : index
    %c0_42 = arith.constant 0 : index
    %c0_43 = arith.constant 0 : index
    %72 = vector.load %arg2[%c7, %c0_42, %c0_43] : memref<9x128x128xf32, #tpu.memory_space<vmem>>, vector<1x128x128xf32>
    %73 = vector.shape_cast %72 : vector<1x128x128xf32> to vector<128x128xf32>
    %cst_44 = arith.constant dense<0.000000e+00> : vector<128x128xf32>
    %74 = tpu.matmul %69, %73, %cst_44 {dimension_numbers = #tpu.dot_dimension_numbers<[1], [0], [0], [1], [0, 0, 1, 1], [], []>} : vector<128x128xf32>, vector<128x128xf32>, vector<128x128xf32> -> vector<128x128xf32>
    %c7_45 = arith.constant 7 : index
    %c0_46 = arith.constant 0 : index
    %c0_47 = arith.constant 0 : index
    %75 = vector.load %arg3[%c7_45, %c0_46, %c0_47] : memref<9x1x128xf32, #tpu.memory_space<vmem>>, vector<1x1x128xf32>
    %76 = vector.shape_cast %75 : vector<1x1x128xf32> to vector<1x128xf32>
    %77 = vector.broadcast %76 : vector<1x128xf32> to vector<128x128xf32>
    %78 = arith.addf %74, %77 : vector<128x128xf32>
    %79 = math.tanh %78 : vector<128x128xf32>
    %80 = arith.addf %70, %78 : vector<128x128xf32>
    %81 = arith.addf %71, %79 : vector<128x128xf32>
    %c0_48 = arith.constant 0 : index
    %c0_49 = arith.constant 0 : index
    %82 = vector.load %arg5[%c0_48, %c0_49] : memref<128x128xf32, #tpu.memory_space<vmem>>, vector<128x128xf32>
    tpu.vector_store %arg5[%c0_48, %c0_49], %80 {strides = array<i32>} : memref<128x128xf32, #tpu.memory_space<vmem>>, vector<128x128xf32>,
    %c0_50 = arith.constant 0 : index
    %c0_51 = arith.constant 0 : index
    %83 = vector.load %arg6[%c0_50, %c0_51] : memref<128x128xf32, #tpu.memory_space<vmem>>, vector<128x128xf32>
    tpu.vector_store %arg6[%c0_50, %c0_51], %81 {strides = array<i32>} : memref<128x128xf32, #tpu.memory_space<vmem>>, vector<128x128xf32>,
    %c8 = arith.constant 8 : index
    %c0_52 = arith.constant 0 : index
    %c0_53 = arith.constant 0 : index
    %84 = vector.load %arg2[%c8, %c0_52, %c0_53] : memref<9x128x128xf32, #tpu.memory_space<vmem>>, vector<1x128x128xf32>
    %85 = vector.shape_cast %84 : vector<1x128x128xf32> to vector<128x128xf32>
    %86 = vector.extract_strided_slice %85 {offsets = [0, 0], sizes = [1, 128], strides = [1, 1]} : vector<128x128xf32> to vector<1x128xf32>
    %c8_54 = arith.constant 8 : index
    %c0_55 = arith.constant 0 : index
    %c0_56 = arith.constant 0 : index
    %87 = vector.load %arg3[%c8_54, %c0_55, %c0_56] : memref<9x1x128xf32, #tpu.memory_space<vmem>>, vector<1x1x128xf32>
    %88 = vector.shape_cast %87 : vector<1x1x128xf32> to vector<1x128xf32>
    %89 = vector.extract_strided_slice %88 {offsets = [0, 0], sizes = [1, 1], strides = [1, 1]} : vector<1x128xf32> to vector<1x1xf32>
    %90 = vector.broadcast %86 : vector<1x128xf32> to vector<128x128xf32>
    %91 = arith.mulf %79, %90 : vector<128x128xf32>
    %cst_57 = arith.constant dense<0.000000e+00> : vector<128xf32>
    %92 = vector.multi_reduction <add>, %91, %cst_57 [1] : vector<128x128xf32> to vector<128xf32>
    %93 = vector.shape_cast %92 : vector<128xf32> to vector<128x1xf32>
    %94 = vector.broadcast %89 : vector<1x1xf32> to vector<128x1xf32>
    %95 = arith.addf %93, %94 : vector<128x1xf32>
    %c0_58 = arith.constant 0 : index
    %c0_59 = arith.constant 0 : index
    %96 = vector.load %arg4[%c0_58, %c0_59] : memref<128x1xf32, #tpu.memory_space<vmem>>, vector<128x1xf32>
    tpu.vector_store %arg4[%c0_58, %c0_59], %95 {strides = array<i32>} : memref<128x1xf32, #tpu.memory_space<vmem>>, vector<128x1xf32>,
    return
  }
  func.func @transform_0(%arg0: i32) -> (i32, i32) {
    %c0_i32 = arith.constant 0 : i32
    %c0_i32_0 = arith.constant 0 : i32
    return %arg0, %c0_i32 : i32, i32
  }
  func.func @transform_1(%arg0: i32) -> (i32, i32, i32) {
    %c0_i32 = arith.constant 0 : i32
    %c0_i32_0 = arith.constant 0 : i32
    %c0_i32_1 = arith.constant 0 : i32
    %c0_i32_2 = arith.constant 0 : i32
    return %c0_i32, %c0_i32_0, %c0_i32_1 : i32, i32, i32
  }
  func.func @transform_2(%arg0: i32) -> (i32, i32, i32) {
    %c0_i32 = arith.constant 0 : i32
    %c0_i32_0 = arith.constant 0 : i32
    %c0_i32_1 = arith.constant 0 : i32
    %c0_i32_2 = arith.constant 0 : i32
    return %c0_i32, %c0_i32_0, %c0_i32_1 : i32, i32, i32
  }
  func.func @transform_3(%arg0: i32) -> (i32, i32) {
    %c0_i32 = arith.constant 0 : i32
    %c0_i32_0 = arith.constant 0 : i32
    return %arg0, %c0_i32 : i32, i32
  }
  func.func @transform_4(%arg0: i32) -> (i32, i32) {
    %c0_i32 = arith.constant 0 : i32
    %c0_i32_0 = arith.constant 0 : i32
    return %arg0, %c0_i32 : i32, i32
  }
  func.func @transform_5(%arg0: i32) -> (i32, i32) {
    %c0_i32 = arith.constant 0 : i32
    %c0_i32_0 = arith.constant 0 : i32
    return %arg0, %c0_i32 : i32, i32
  }
}

</mosaic_0001>

<bundles_post_ra>
// kernel: tpu_custom_call.1
= control target key start
LH: loop header
LB: loop body
LE: loop exit
PB: predicated region body
PF: predicated region fallthrough
CT: control target
= control target key end

     0   :  { %11 = vsyncpa [#allocation3], 0  ;;  %s4894_s0 = inlined_call_operand.vmem [shape: f32[512,1], index: 0, kind: input, shape index: {}]   ;;  %s4895_s1 = inlined_call_operand.hbm [shape: f32[9,128,128], index: 1, kind: input, shape index: {}]   ;;  %s4896_s2 = inlined_call_operand.vmem [shape: f32[9,1,128], index: 2, kind: input, shape index: {}]   ;;  %s4897_s3 = inlined_call_operand.vmem [shape: f32[512,1], index: 3, kind: output, shape index: {0}]   ;;  %s4898_s4 = inlined_call_operand.hbm [shape: f32[512,128], index: 4, kind: output, shape index: {1}]   ;;  %s4899_s5 = inlined_call_operand.hbm [shape: f32[512,128], index: 5, kind: output, shape index: {2}]  }
   0x1   :  { %12 = vsyncpa [#allocation4], 0 }
   0x2   :  { %14 = vsyncpa [#allocation4 + $0x1], 0 }
   0x3   :  { %15 = vsyncpa [#allocation7], 0 }
   0x4   :  { %17 = vsyncpa [#allocation7 + $0x1], 0  ;;  %s3629_s18 = smov 0   ;;  %s3631_s19 = smov 0  }
   0x5   :  { %s3633_s20 = smov 0   ;;  %s3635_s21 = smov 0  }
   0x6 LB: > { %s3650_s22 = sadd.s32 4294967295, %s3589_s21   ;;  %s2250_s23 = sadd.s32 4294967294, %s3589_s21   ;;  %s3589_s21 = sphi %s3635_s21, %s4970_s21   ;;  %s3585_s20 = sphi %s3633_s20, %s4969_s20   ;;  %s3581_s19 = sphi %s3631_s19, %s4968_s19   ;;  %s3577_s18 = sphi %s3629_s18, %s4967_s18  }
   0x7   : > { %s3654_s24 = sadd.s32 1, %s3589_s21   ;;  %s124_s25 = sadd.s32 1, %s3585_s20 }
   0x8   : > { %s121_s26 = ssub.s32 %s3589_s21, %s3654_s24  ;;  %p134_p0 = scmp.ne.s32.totalorder %s3585_s20, %s3581_s19 }
   0x9   : > { %p122_p1 = scmp.eq.s32.totalorder %s121_s26, 0  ;;  %p135_p2 = scmp.eq.s32.totalorder %s3650_s22, 3 }
   0xa   : > { %p140_p3 = scmp.ne.s32.totalorder %s3581_s19, %s3577_s18  ;;  %p141_p4 = scmp.eq.s32.totalorder %s2250_s23, 3 }
   0xb   : > { %s3665_s27 = scalar_select %p122_p1, %s3585_s20, %s124_s25  }
   0xc   : > { %p3667_p5 = por %p135_p2, %p134_p0  ;;  %p3671_p6 = por %p141_p4, %p140_p3 }
   0xd   : > { %p2251_p7 = scmp.ge.s32.totalorder %s3589_s21, 1  ;;  %p174_p8 = scmp.lt.s32.totalorder %s3589_s21, 5 }
   0xe   : > { %s4922_s28 = scalar_select %p3667_p5, 1, 0 }
   0xf   : > { %s4923_s29 = scalar_select %p3671_p6, 1, 0 }
  0x10   : > { %p4900_p9 = scmp.eq.s32.totalorder %s3650_s22, 0  ;;  %p3678_p10 = pnand %p2251_p7, %p174_p8 }
  0x11   : > { %s3591_s6 = smov [#allocation2]   ;;  %s3463_s11 = scalar_lea.hbm %s4895_s1, 18432 }
  0x12   : > { %s4924_s30 = scalar_select %p3678_p10, 1, 0 }
  0x13   : > { %s186_s7 = sshll.u32 %s3591_s6, 4  ;;  %p3153_p11 = pneg %p3678_p10  ;;  %s187_s7 = int_to_ptr.vmem [resolvable:$true] %s186_s7 }
  0x14   : > { %p3464_p13 = scmp.ne.s32.totalorder %s4895_s1, %s3463_s11  ;;  %p3470_p3 = scmp.lt.u32.totalorder %s3463_s11, %s4895_s1 }
  0x15   : > { %p3686_p12 = pnand %p4900_p9, %p3153_p11 }
  0x17   : > { %p3465_p0 = pneg %p3686_p12 }
  0x19   : > { %p3466_p1 = pnand %p3465_p0, %p3464_p13 }
  0x1b   : > { %p3467_p2 = pneg %p3466_p1 }
  0x1d   : > { %p3472_p4 = pnand %p3470_p3, %p3467_p2 }
  0x1f   : > { %3475 = shalt.err (!%p3472_p4)
}
  0x20   : > { %s3476_s16 = scalar_lea.vmem %s187_s7, 18432  ;;  %p3484_p9 = scmp.lt.s32.totalorder %s187_s7, %s187_s7 }
  0x21   : > { %p3477_p7 = scmp.ne.s32.totalorder %s187_s7, %s3476_s16  ;;  %p3485_p6 = scmp.lt.s32.totalorder %s3476_s16, %s3476_s16 }
  0x23   : > { %p3479_p8 = pnand %p3477_p7, %p3465_p0  ;;  %p3486_p5 = por %p3485_p6, %p3484_p9 }
  0x25   : > { %p3480_p11 = pneg %p3479_p8 }
  0x27   : > { %p3487_p10 = pnand %p3486_p5, %p3480_p11 }
  0x29   : > { %3490 = shalt.err (!%p3487_p10)
}
  0x2a   : > { %s3592_s17 = smov 128   ;;  %s3593_s23 = smov 8  }
  0x2b   : > { %3156 = dma.hbm_to_vmem [thread:$0]  (!%p3686_p12), %s4895_s1, 18432, %s187_s7, [#allocation3], %s3592_s17, %s3592_s17, %s3593_s23  }
  0x2c   : > { %p4926_p13 = scmp.ne.s32.totalorder %s4924_s30, 0 }
  0x2e   : > { %214 = sbr.rel (%p4926_p13) target bundleno = 1977 (0x7b9), region = 32 }
  0x35   : > { %p4927_p1 = scmp.eq.s32.totalorder %s3650_s22, 0 }
  0x37   : > { %3564 = dma.done.wait (%p4927_p1), [#allocation3], 18432   ;;  %p4928_p0 = pmov %p4927_p1 }
  0x38   : > { %s2258_s6 = sshll.u32 %s3650_s22, 4  ;;  %v3594_v0 = vmov 0   ;;  %v423_v6 = vld [vmem:[#allocation2 + $0x80] sm:$0xff]  ;;  %v424_v7 = vld [vmem:[#allocation2 + $0x88] sm:$0xff]  ;;  %v425_v10 = vld [vmem:[#allocation2 + $0x90] sm:$0xff]  ;;  %v363_v53 = vlaneseq  ;;  %s4644_s10 = sand.u32 1, %s3581_s19  }
  0x39   : > { %3566 = vsyncadd (%p4928_p0), [#allocation3], 4294948864  ;;  %3206 = vset.pattern.permute.xlu1 %v3594_v0  ;;  %3205 = vset.pattern.permute.xlu0 %v3594_v0  ;;  %p253_p5 = scmp.lt.s32.totalorder %s2258_s6, 63  ;;  %v2905_v9 = vpack.c.bf16 %v424_v7, %v423_v6  ;;  %v426_v11 = vld [vmem:[#allocation2 + $0x98] sm:$0xff]  ;;  %v427_v13 = vld [vmem:[#allocation2 + $0xa0] sm:$0xff]  ;;  %s2256_s13 = sshll.u32 %s4644_s10, 7 }
  0x3a   : > { %v2909_v12 = vpack.c.bf16 %v426_v11, %v425_v10  ;;  %v428_v14 = vld [vmem:[#allocation2 + $0xa8] sm:$0xff]  ;;  %v429_v18 = vld [vmem:[#allocation2 + $0xb0] sm:$0xff]  ;;  %v430_v19 = vld [vmem:[#allocation2 + $0xb8] sm:$0xff]  ;;  %v3739_v54 = vshrl.u32 %v363_v53, 7  ;;  %s4658_s14 = scalar_lea.vmem [#allocation5], %s2256_s13  ;;  %s4687_s15 = scalar_lea.vmem [#allocation6], %s2256_s13 }
  0x3b   : > { %s4972_s6 = smov (!%p253_p5, %s2258_s6), 63  ;;  %2906 = vmatprep.subr.bf16.mxu0 %v2905_v9  ;;  %v2913_v17 = vpack.c.bf16 %v428_v14, %v427_v13  ;;  %v2917_v22 = vpack.c.bf16 %v430_v19, %v429_v18  ;;  %v431_v23 = vld [vmem:[#allocation2 + $0xc0] sm:$0xff]  ;;  %v432_v24 = vld [vmem:[#allocation2 + $0xc8] sm:$0xff]  ;;  %v433_v28 = vld [vmem:[#allocation2 + $0xd0] sm:$0xff]  ;;  %s2287_s16 = sshll.u32 %s3650_s22, 11 }
  0x3c   : > { %s4921_s7 = sshll.u32 %s4972_s6, 3  ;;  %2908 = vmatpush3.bf16.msra.mxu0 %v2905_v9  ;;  %v2921_v27 = vpack.c.bf16 %v432_v24, %v431_v23  ;;  %v434_v29 = vld [vmem:[#allocation2 + $0xd8] sm:$0xff]  ;;  %v435_v33 = vld [vmem:[#allocation2 + $0xe0] sm:$0xff]  ;;  %v436_v34 = vld [vmem:[#allocation2 + $0xe8] sm:$0xff]  ;;  %4929 = vst [vmem:[#allocation11_spill] sm:$0xff] %v3739_v54  ;;  %v4903_v55 = vsub.s32 0, %v3739_v54  ;;  %s4767_s26 = scalar_lea.hbm %s4898_s4, %s2287_s16 }
  0x3d   : > { %s3721_s9 = scalar_lea.vmem %s4894_s0, %s4921_s7  ;;  %2910 = vmatprep.subr.bf16.mxu0 %v2909_v12  ;;  %v2925_v32 = vpack.c.bf16 %v434_v29, %v433_v28  ;;  %v2929_v37 = vpack.c.bf16 %v436_v34, %v435_v33  ;;  %v437_v38 = vld [vmem:[#allocation2 + $0xf0] sm:$0xff]  ;;  %v438_v39 = vld [vmem:[#allocation2 + $0xf8] sm:$0xff]  ;;  %v641_v41 = vld [vmem:[#allocation2 + $0x100] sm:$0xff]  ;;  %s2103_s17 = sshll.u32 %s4658_s14, 4  ;;  %s4769_s17 = int_to_ptr.vmem [resolvable:$true] %s2103_s17 }
  0x3e   : > { %v268_v1 = vld [vmem:[%s3721_s9 + $0x10] sm:$0xff]  ;;  %v266_v2 = vld [vmem:[%s3721_s9] sm:$0xff]  ;;  %v269_v3 = vld [vmem:[%s3721_s9 + $0x18] sm:$0xff]  ;;  %v2933_v40 = vpack.c.bf16 %v438_v39, %v437_v38  ;;  %s2081_s30 = scalar_lea.sflag [#allocation4], %s4644_s10  ;;  %s3491_s8 = scalar_lea.vmem %s4769_s17, 2048 }
  0x3f   : > { %295 = vperm.xlu1 %3206, %v268_v1   ;;  %285 = vperm.xlu0 %3205, %v266_v2   ;;  %v267_v4 = vld [vmem:[%s3721_s9 + $0x8] sm:$0xff]  ;;  %v270_v8 = vld [vmem:[%s3721_s9 + $0x20] sm:$0xff]  ;;  %v273_v15 = vld [vmem:[%s3721_s9 + $0x38] sm:$0xff]  ;;  %p3492_p6 = scmp.ne.s32.totalorder %s4769_s17, %s3491_s8  ;;  %p4964_p9 = scmp.ne.s32.totalorder %s4922_s28, 0 }
  0x40   : > { %v271_v5 = vld [vmem:[%s3721_s9 + $0x28] sm:$0xff]  ;;  %v272_v16 = vld [vmem:[%s3721_s9 + $0x30] sm:$0xff]  ;;  %v274_v21 = vld [vmem:[%s3721_s9 + $0x40] sm:$0xff]  ;;  %2912 = vmatpush3.bf16.msra.mxu0 %v2909_v12 }
  0x41   : > { %v275_v20 = vld [vmem:[%s3721_s9 + $0x48] sm:$0xff]  ;;  %2914 = vmatprep.subr.bf16.mxu0 %v2913_v17  ;;  %v277_v25 = vld [vmem:[%s3721_s9 + $0x58] sm:$0xff]  ;;  %v276_v26 = vld [vmem:[%s3721_s9 + $0x50] sm:$0xff]  ;;  %p3493_p10 = pnand %p3492_p6, %p4964_p9 }
  0x42   : > { %v279_v30 = vld [vmem:[%s3721_s9 + $0x68] sm:$0xff]  ;;  %v278_v31 = vld [vmem:[%s3721_s9 + $0x60] sm:$0xff]  ;;  %v281_v35 = vld [vmem:[%s3721_s9 + $0x78] sm:$0xff] }
  0x43   : > { %300 = vperm.xlu1 %3206, %v269_v3   ;;  %290 = vperm.xlu0 %3205, %v267_v4   ;;  %v280_v36 = vld [vmem:[%s3721_s9 + $0x70] sm:$0xff]  ;;  %v642_v42 = vld [vmem:[#allocation2 + $0x108] sm:$0xff]  ;;  %v643_v43 = vld [vmem:[#allocation2 + $0x110] sm:$0xff]  ;;  %p3494_p12 = pneg %p3493_p10  ;;  %s3595_s9 = smov [#allocation5]  }
  0x44   : > { %2916 = vmatpush3.bf16.msra.mxu0 %v2913_v17  ;;  %v2937_v44 = vpack.c.bf16 %v642_v42, %v641_v41  ;;  %v644_v45 = vld [vmem:[#allocation2 + $0x118] sm:$0xff]  ;;  %v645_v47 = vld [vmem:[#allocation2 + $0x120] sm:$0xff]  ;;  %v646_v48 = vld [vmem:[#allocation2 + $0x128] sm:$0xff]  ;;  %s3495_s11 = sshll.u32 %s3595_s9, 4  ;;  %s3496_s11 = int_to_ptr.vmem [resolvable:$false] %s3495_s11 }
  0x45   : > { %2918 = vmatprep.subr.bf16.mxu0 %v2917_v22  ;;  %v2941_v46 = vpack.c.bf16 %v644_v45, %v643_v43  ;;  %v2945_v49 = vpack.c.bf16 %v646_v48, %v645_v47  ;;  %v647_v50 = vld [vmem:[#allocation2 + $0x130] sm:$0xff]  ;;  %v648_v51 = vld [vmem:[#allocation2 + $0x138] sm:$0xff]  ;;  %v282_v56 = vld [vmem:[#allocation2] sm:$0xff]  ;;  %s3497_s12 = scalar_lea.vmem %s3496_s11, 4096  ;;  %p3498_p2 = scmp.lt.s32.totalorder %s4769_s17, %s3496_s11 }
  0x46   : > { %2938 = vmatprep.subr.bf16.mxu1 %v2937_v44  ;;  %v2949_v52 = vpack.c.bf16 %v648_v51, %v647_v50  ;;  %v3744_v57 = vrot.slane %v282_v56, %v4903_v55  ;;  %v3749_v58 = vld [vmem:[%s4896_s2] ss:$0 sm:$0xff]  ;;  %p3499_p3 = scmp.lt.s32.totalorder %s3497_s12, %s3491_s8 }
  0x47   : > { %310 = vperm.xlu1 %3206, %v271_v5   ;;  %305 = vperm.xlu0 %3205, %v270_v8  }
  0x48   : > { %2920 = vmatpush3.bf16.msra.mxu0 %v2917_v22  ;;  %2940 = vmatpush3.bf16.msra.mxu1 %v2937_v44  ;;  %p3500_p4 = por %p3499_p3, %p3498_p2 }
  0x49   : > { %2922 = vmatprep.subr.bf16.mxu0 %v2921_v27  ;;  %2942 = vmatprep.subr.bf16.mxu1 %v2941_v46 }
  0x4a   : > { %p3501_p7 = pnand %p3500_p4, %p3494_p12 }
  0x4b   : > { %320 = vperm.xlu1 %3206, %v273_v15   ;;  %315 = vperm.xlu0 %3205, %v272_v16  }
  0x4c   : > { %2924 = vmatpush3.bf16.msra.mxu0 %v2921_v27  ;;  %2944 = vmatpush3.bf16.msra.mxu1 %v2941_v46 }
  0x4d   : > { %2926 = vmatprep.subr.bf16.mxu0 %v2925_v32  ;;  %2946 = vmatprep.subr.bf16.mxu1 %v2945_v49 }
  0x4f   : > { %330 = vperm.xlu1 %3206, %v275_v20   ;;  %325 = vperm.xlu0 %3205, %v274_v21  }
  0x50   : > { %2928 = vmatpush3.bf16.msra.mxu0 %v2925_v32  ;;  %2948 = vmatpush3.bf16.msra.mxu1 %v2945_v49 }
  0x51   : > { %2930 = vmatprep.subr.bf16.mxu0 %v2929_v37  ;;  %2950 = vmatprep.subr.bf16.mxu1 %v2949_v52 }
  0x53   : > { %340 = vperm.xlu1 %3206, %v277_v25   ;;  %335 = vperm.xlu0 %3205, %v276_v26  }
  0x54   : > { %2932 = vmatpush3.bf16.msra.mxu0 %v2929_v37  ;;  %2952 = vmatpush3.bf16.msra.mxu1 %v2949_v52 }
  0x55   : > { %2934 = vmatprep.subr.bf16.mxu0 %v2933_v40 }
  0x57   : > { %350 = vperm.xlu1 %3206, %v279_v30   ;;  %345 = vperm.xlu0 %3205, %v278_v31  }
  0x58   : > { %2936 = vmatpush3.bf16.msra.mxu0 %v2933_v40 }
  0x5b   : > { %360 = vperm.xlu1 %3206, %v281_v35   ;;  %355 = vperm.xlu0 %3205, %v280_v36  }
  0xbe   : > { %v296_v59 = vpop.permute.xlu1 %295  ;;  %v286_v60 = vpop.permute.xlu0 %285 }
  0xbf   : > { %v369_v61 = vmul.f32 %v3744_v57, %v296_v59  ;;  %v367_v62 = vmul.f32 %v3744_v57, %v286_v60 }
  0xc1   : > { %v3754_v63 = vadd.f32 %v3749_v58, %v367_v62  ;;  %v3757_v2 = vadd.f32 %v3749_v58, %v369_v61  ;;  %v649_v61 = vld [vmem:[#allocation2 + $0x140] sm:$0xff]  ;;  %v650_v62 = vld [vmem:[#allocation2 + $0x148] sm:$0xff] }
  0xc2   : > { %v301_v0 = vpop.permute.xlu1 %300  ;;  %v291_v1 = vpop.permute.xlu0 %290 }
  0xc3   : > { %v370_v3 = vmul.f32 %v3744_v57, %v301_v0  ;;  %v368_v4 = vmul.f32 %v3744_v57, %v291_v1  ;;  %3207 = vtanh.f32 %v3754_v63  ;;  %v2953_v0 = vpack.c.bf16 %v650_v62, %v649_v61  ;;  %v651_v1 = vld [vmem:[#allocation2 + $0x150] sm:$0xff] }
  0xc4   : > { %3209 = vtanh.f32 %v3757_v2 }
  0xc5   : > { %v3763_v5 = vadd.f32 %v3749_v58, %v368_v4  ;;  %v3767_v8 = vadd.f32 %v3749_v58, %v370_v3  ;;  %2954 = vmatprep.subr.bf16.mxu1 %v2953_v0  ;;  %v652_v3 = vld [vmem:[#allocation2 + $0x158] sm:$0xff] }
  0xc6   : > { %v311_v6 = vpop.permute.xlu1 %310  ;;  %v306_v7 = vpop.permute.xlu0 %305  ;;  %2956 = vmatpush3.bf16.msra.mxu1 %v2953_v0  ;;  %v2957_v4 = vpack.c.bf16 %v652_v3, %v651_v1 }
  0xc7   : > { %v372_v9 = vmul.f32 %v3744_v57, %v311_v6  ;;  %v371_v10 = vmul.f32 %v3744_v57, %v306_v7  ;;  %3211 = vtanh.f32 %v3763_v5  ;;  %v653_v6 = vld [vmem:[#allocation2 + $0x160] sm:$0xff]  ;;  %v654_v7 = vld [vmem:[#allocation2 + $0x168] sm:$0xff] }
  0xc8   : > { %3213 = vtanh.f32 %v3767_v8  ;;  %2958 = vmatprep.subr.bf16.mxu1 %v2957_v4 }
  0xc9   : > { %v3773_v11 = vadd.f32 %v3749_v58, %v371_v10  ;;  %v3777_v14 = vadd.f32 %v3749_v58, %v372_v9  ;;  %v2961_v9 = vpack.c.bf16 %v654_v7, %v653_v6  ;;  %v655_v10 = vld [vmem:[#allocation2 + $0x170] sm:$0xff] }
  0xca   : > { %v321_v12 = vpop.permute.xlu1 %320  ;;  %v316_v13 = vpop.permute.xlu0 %315  ;;  %2960 = vmatpush3.bf16.msra.mxu1 %v2957_v4 }
  0xcb   : > { %v374_v15 = vmul.f32 %v3744_v57, %v321_v12  ;;  %v373_v16 = vmul.f32 %v3744_v57, %v316_v13  ;;  %3215 = vtanh.f32 %v3773_v11  ;;  %2962 = vmatprep.subr.bf16.mxu1 %v2961_v9  ;;  %v656_v12 = vld [vmem:[#allocation2 + $0x178] sm:$0xff] }
  0xcc   : > { %3217 = vtanh.f32 %v3777_v14  ;;  %v2965_v13 = vpack.c.bf16 %v656_v12, %v655_v10 }
  0xcd   : > { %v3783_v17 = vadd.f32 %v3749_v58, %v373_v16  ;;  %v3785_v18 = vpop.eup %3207  ;;  %v3789_v21 = vadd.f32 %v3749_v58, %v374_v15  ;;  %v859_v15 = vld [vmem:[#allocation2 + $0x180] sm:$0xff]  ;;  %v860_v16 = vld [vmem:[#allocation2 + $0x188] sm:$0xff] }
  0xce   : > { %v331_v19 = vpop.permute.xlu1 %330  ;;  %v326_v20 = vpop.permute.xlu0 %325  ;;  %2545 = vmatprep.mubr.f32.mxu0 %v3785_v18  ;;  %2964 = vmatpush3.bf16.msra.mxu1 %v2961_v9 }
  0xcf   : > { %v376_v22 = vmul.f32 %v3744_v57, %v331_v19  ;;  %v375_v23 = vmul.f32 %v3744_v57, %v326_v20  ;;  %3219 = vtanh.f32 %v3783_v17  ;;  %v3795_v24 = vpop.eup %3209  ;;  %2966 = vmatprep.subr.bf16.mxu1 %v2965_v13  ;;  %v861_v19 = vld [vmem:[#allocation2 + $0x190] sm:$0xff]  ;;  %v2969_v20 = vpack.c.bf16 %v860_v16, %v859_v15 }
  0xd0   : > { %3221 = vtanh.f32 %v3789_v21 }
  0xd1   : > { %v3798_v25 = vadd.f32 %v3749_v58, %v375_v23  ;;  %v3800_v26 = vpop.eup %3211  ;;  %v3804_v29 = vadd.f32 %v3749_v58, %v376_v22  ;;  %v862_v22 = vld [vmem:[#allocation2 + $0x198] sm:$0xff]  ;;  %2970 = vmatprep.subr.bf16.mxu0 %v2969_v20 }
  0xd2   : > { %v341_v27 = vpop.permute.xlu1 %340  ;;  %v336_v28 = vpop.permute.xlu0 %335  ;;  %2546 = vmatmul.mubr.f32.vlgmr.msra.gmra.mrb[0].mxu0 %v3800_v26  ;;  %2968 = vmatpush3.bf16.msra.mxu1 %v2965_v13  ;;  %v2973_v23 = vpack.c.bf16 %v862_v22, %v861_v19 }
  0xd3   : > { %v378_v30 = vmul.f32 %v3744_v57, %v341_v27  ;;  %v377_v31 = vmul.f32 %v3744_v57, %v336_v28  ;;  %3223 = vtanh.f32 %v3798_v25  ;;  %2548 = vmatprep.mubr.f32.mxu0 %v3795_v24  ;;  %v3811_v32 = vpop.eup %3213  ;;  %v863_v27 = vld [vmem:[#allocation2 + $0x1a0] sm:$0xff]  ;;  %v864_v28 = vld [vmem:[#allocation2 + $0x1a8] sm:$0xff]  ;;  %2972 = vmatpush3.bf16.msra.mxu0 %v2969_v20 }
  0xd4   : > { %3225 = vtanh.f32 %v3804_v29  ;;  %2974 = vmatprep.subr.bf16.mxu0 %v2973_v23 }
  0xd5   : > { %v3814_v33 = vadd.f32 %v3749_v58, %v377_v31  ;;  %v3816_v34 = vpop.eup %3215  ;;  %v3820_v37 = vadd.f32 %v3749_v58, %v378_v30  ;;  %v2977_v30 = vpack.c.bf16 %v864_v28, %v863_v27  ;;  %v865_v31 = vld [vmem:[#allocation2 + $0x1b0] sm:$0xff] }
  0xd6   : > { %v351_v35 = vpop.permute.xlu1 %350  ;;  %v346_v36 = vpop.permute.xlu0 %345  ;;  %2549 = vmatmul.mubr.f32.gmra.mrb[2].mxu0 %v3811_v32 }
  0xd7   : > { %v380_v38 = vmul.f32 %v3744_v57, %v351_v35  ;;  %v379_v39 = vmul.f32 %v3744_v57, %v346_v36  ;;  %3227 = vtanh.f32 %v3814_v33  ;;  %2551 = vmatprep.mubr.f32.mxu0 %v3816_v34  ;;  %v3827_v40 = vpop.eup %3217  ;;  %v866_v35 = vld [vmem:[#allocation2 + $0x1b8] sm:$0xff]  ;;  %2976 = vmatpush3.bf16.msra.mxu0 %v2973_v23 }
  0xd8   : > { %3229 = vtanh.f32 %v3820_v37  ;;  %2978 = vmatprep.subr.bf16.mxu0 %v2977_v30  ;;  %v2981_v36 = vpack.c.bf16 %v866_v35, %v865_v31 }
  0xd9   : > { %v3830_v41 = vadd.f32 %v3749_v58, %v379_v39  ;;  %v3832_v42 = vpop.eup %3219  ;;  %v3836_v45 = vadd.f32 %v3749_v58, %v380_v38  ;;  %v867_v38 = vld [vmem:[#allocation2 + $0x1c0] sm:$0xff]  ;;  %v868_v39 = vld [vmem:[#allocation2 + $0x1c8] sm:$0xff] }
  0xda   : > { %v361_v43 = vpop.permute.xlu1 %360  ;;  %v356_v44 = vpop.permute.xlu0 %355  ;;  %2552 = vmatmul.mubr.f32.gmra.mrb[4].mxu0 %v3827_v40 }
  0xdb   : > { %v381_v46 = vmul.f32 %v3744_v57, %v356_v44  ;;  %3231 = vtanh.f32 %v3830_v41  ;;  %v382_v47 = vmul.f32 %v3744_v57, %v361_v43  ;;  %2554 = vmatprep.mubr.f32.mxu0 %v3832_v42  ;;  %v3843_v48 = vpop.eup %3221  ;;  %2980 = vmatpush3.bf16.msra.mxu0 %v2977_v30  ;;  %v2985_v43 = vpack.c.bf16 %v868_v39, %v867_v38  ;;  %v3882_v44 = vld [vmem:[%s4896_s2 + $0x1] ss:$0 sm:$0xff] }
  0xdc   : > { %3233 = vtanh.f32 %v3836_v45  ;;  %2982 = vmatprep.subr.bf16.mxu0 %v2981_v36 }
  0xdd   : > { %v3846_v49 = vadd.f32 %v3749_v58, %v381_v46  ;;  %v3848_v50 = vpop.eup %3223  ;;  %v3853_v51 = vadd.f32 %v3749_v58, %v382_v47 }
  0xde   : > { %2555 = vmatmul.mubr.f32.gmra.mrb[6].mxu0 %v3843_v48  ;;  %v3857_v52 = vpop.eup %3225 }
  0xdf   : > { %4930 = vst [vmem:[#allocation12_spill] sm:$0xff] %v3846_v49  ;;  %4931 = vst [vmem:[#allocation13_spill] sm:$0xff] %v3853_v51  ;;  %3235 = vtanh.f32 %v3846_v49  ;;  %2557 = vmatprep.mubr.f32.mxu0 %v3848_v50  ;;  %2984 = vmatpush3.bf16.msra.mxu0 %v2981_v36 }
  0xe0   : > { %3237 = vtanh.f32 %v3853_v51  ;;  %2986 = vmatprep.subr.bf16.mxu0 %v2985_v43  ;;  %v1081_v51 = vld [vmem:[#allocation2 + $0x220] sm:$0xff] }
  0xe1   : > { %v3859_v53 = vpop.eup %3227 }
  0xe2   : > { %4932 = vst [vmem:[#allocation14_spill] sm:$0xff] %v3859_v53  ;;  %2558 = vmatmul.mubr.f32.gmra.mrb[8].mxu0 %v3857_v52  ;;  %v3864_v56 = vpop.eup %3229 }
  0xe3   : > { %2560 = vmatprep.mubr.f32.mxu0 %v3859_v53  ;;  %4933 = vst [vmem:[#allocation15_spill] sm:$0xff] %v3864_v56  ;;  %2988 = vmatpush3.bf16.msra.mxu0 %v2985_v43 }
  0xe5   : > { %v3866_v57 = vpop.eup %3231 }
  0xe6   : > { %4934 = vst [vmem:[#allocation16_spill] sm:$0xff] %v3866_v57  ;;  %2561 = vmatmul.mubr.f32.gmra.mrb[10].mxu0 %v3864_v56  ;;  %v3870_v58 = vpop.eup %3233  ;;  %v1077_v56 = vld [vmem:[#allocation2 + $0x200] sm:$0xff] }
  0xe7   : > { %2563 = vmatprep.mubr.f32.mxu0 %v3866_v57  ;;  %4935 = vst [vmem:[#allocation17_spill] sm:$0xff] %v3870_v58 }
  0xe9   : > { %v3872_v59 = vpop.eup %3235 }
  0xea   : > { %4936 = vst [vmem:[#allocation18_spill] sm:$0xff] %v3872_v59  ;;  %2564 = vmatmul.mubr.f32.gmra.mrb[12].mxu0 %v3870_v58  ;;  %v3876_v60 = vpop.eup %3237  ;;  %v871_v58 = vld [vmem:[#allocation2 + $0x1e0] sm:$0xff] }
  0xeb   : > { %2566 = vmatprep.mubr.f32.mxu0 %v3872_v59  ;;  %4937 = vst [vmem:[#allocation19_spill] sm:$0xff] %v3876_v60  ;;  %v869_v59 = vld [vmem:[#allocation2 + $0x1d0] sm:$0xff] }
  0xee   : > { %2567 = vmatmul.mubr.f32.gmra.mrb[14].mxu0 %v3876_v60  ;;  %v870_v60 = vld [vmem:[#allocation2 + $0x1d8] sm:$0xff] }
  0xef   : > { %v2989_v57 = vpack.c.bf16 %v870_v60, %v869_v59  ;;  %v1082_v59 = vld [vmem:[#allocation2 + $0x228] sm:$0xff]  ;;  %v1084_v60 = vld [vmem:[#allocation2 + $0x238] sm:$0xff] }
  0xf1   : > { %2990 = vmatprep.subr.bf16.mxu0 %v2989_v57 }
  0xf2   : > { %2992 = vmatpush3.bf16.msra.mxu0 %v2989_v57  ;;  %v3009_v57 = vpack.c.bf16 %v1082_v59, %v1081_v51 }
 0x1a5   : > { %v2547_v46 = vpop.f32.mrb[0].mxu0 }
 0x1a6   : > { %v3885_v47 = vadd.f32 %v2547_v46, %v3882_v44  ;;  %v513_v61 = vpop.f32.mrb[1].mxu0 }
 0x1a7   : > { %v3888_v62 = vadd.f32 %v3882_v44, %v513_v61 }
 0x1a9   : > { %3239 = vtanh.f32 %v3888_v62  ;;  %v2550_v0 = vpop.f32.mrb[2].mxu0 }
 0x1aa   : > { %3241 = vtanh.f32 %v3885_v47  ;;  %v3893_v1 = vadd.f32 %v2550_v0, %v3882_v44  ;;  %v523_v3 = vpop.f32.mrb[3].mxu0 }
 0x1ab   : > { %v3896_v4 = vadd.f32 %v3882_v44, %v523_v3 }
 0x1ad   : > { %3243 = vtanh.f32 %v3896_v4  ;;  %v2553_v6 = vpop.f32.mrb[4].mxu0 }
 0x1ae   : > { %3245 = vtanh.f32 %v3893_v1  ;;  %v3901_v7 = vadd.f32 %v2553_v6, %v3882_v44  ;;  %v533_v9 = vpop.f32.mrb[5].mxu0 }
 0x1af   : > { %v3904_v10 = vadd.f32 %v3882_v44, %v533_v9 }
 0x1b1   : > { %3247 = vtanh.f32 %v3904_v10  ;;  %v2556_v12 = vpop.f32.mrb[6].mxu0 }
 0x1b2   : > { %3249 = vtanh.f32 %v3901_v7  ;;  %v3909_v13 = vadd.f32 %v2556_v12, %v3882_v44  ;;  %v543_v15 = vpop.f32.mrb[7].mxu0 }
 0x1b3   : > { %v3911_v16 = vpop.eup %3239  ;;  %v3914_v19 = vadd.f32 %v3882_v44, %v543_v15 }
 0x1b4   : > { %v3916_v20 = vpop.eup %3241  ;;  %2601 = vmatprep.mubr.f32.mxu1 %v3911_v16 }
 0x1b5   : > { %3251 = vtanh.f32 %v3914_v19  ;;  %v2559_v22 = vpop.f32.mrb[8].mxu0  ;;  %2602 = vmatmul.mubr.f32.vlgmr.msra.gmra.mrb[0].mxu1 %v3916_v20 }
 0x1b6   : > { %3253 = vtanh.f32 %v3909_v13  ;;  %v3923_v23 = vadd.f32 %v2559_v22, %v3882_v44  ;;  %v553_v27 = vpop.f32.mrb[9].mxu0 }
 0x1b7   : > { %v3925_v28 = vpop.eup %3243  ;;  %v3928_v30 = vadd.f32 %v3882_v44, %v553_v27 }
 0x1b8   : > { %v3930_v31 = vpop.eup %3245  ;;  %2604 = vmatprep.mubr.f32.mxu1 %v3925_v28 }
 0x1b9   : > { %3255 = vtanh.f32 %v3928_v30  ;;  %v2562_v35 = vpop.f32.mrb[10].mxu0  ;;  %2605 = vmatmul.mubr.f32.gmra.mrb[2].mxu1 %v3930_v31 }
 0x1ba   : > { %3257 = vtanh.f32 %v3923_v23  ;;  %v3937_v36 = vadd.f32 %v2562_v35, %v3882_v44  ;;  %v563_v38 = vpop.f32.mrb[11].mxu0 }
 0x1bb   : > { %v3939_v39 = vpop.eup %3247  ;;  %v3942_v43 = vadd.f32 %v3882_v44, %v563_v38 }
 0x1bc   : > { %v3944_v46 = vpop.eup %3249  ;;  %2607 = vmatprep.mubr.f32.mxu1 %v3939_v39 }
 0x1bd   : > { %3259 = vtanh.f32 %v3942_v43  ;;  %v2565_v61 = vpop.f32.mrb[12].mxu0  ;;  %2608 = vmatmul.mubr.f32.gmra.mrb[4].mxu1 %v3944_v46 }
 0x1be   : > { %3261 = vtanh.f32 %v3937_v36  ;;  %v3951_v0 = vadd.f32 %v2565_v61, %v3882_v44  ;;  %v573_v3 = vpop.f32.mrb[13].mxu0 }
 0x1bf   : > { %v3953_v6 = vpop.eup %3251  ;;  %v3956_v9 = vadd.f32 %v3882_v44, %v573_v3 }
 0x1c0   : > { %v3958_v12 = vpop.eup %3253  ;;  %2610 = vmatprep.mubr.f32.mxu1 %v3953_v6 }
 0x1c1   : > { %3263 = vtanh.f32 %v3956_v9  ;;  %v2568_v15 = vpop.f32.mrb[14].mxu0  ;;  %2611 = vmatmul.mubr.f32.gmra.mrb[6].mxu1 %v3958_v12 }
 0x1c2   : > { %3265 = vtanh.f32 %v3951_v0  ;;  %v3965_v22 = vadd.f32 %v2568_v15, %v3882_v44  ;;  %v583_v27 = vpop.f32.mrb[15].mxu0 }
 0x1c3   : > { %v3967_v35 = vpop.eup %3255  ;;  %v3970_v38 = vadd.f32 %v3882_v44, %v583_v27 }
 0x1c4   : > { %4938 = vst [vmem:[#allocation20_spill] sm:$0xff] %v3965_v22  ;;  %v3972_v61 = vpop.eup %3257  ;;  %2613 = vmatprep.mubr.f32.mxu1 %v3967_v35 }
 0x1c5   : > { %4939 = vst [vmem:[#allocation21_spill] sm:$0xff] %v3970_v38  ;;  %3267 = vtanh.f32 %v3970_v38  ;;  %2614 = vmatmul.mubr.f32.gmra.mrb[8].mxu1 %v3972_v61  ;;  %v1078_v38 = vld [vmem:[#allocation2 + $0x208] sm:$0xff] }
 0x1c6   : > { %3269 = vtanh.f32 %v3965_v22  ;;  %v3001_v49 = vpack.c.bf16 %v1078_v38, %v1077_v56 }
 0x1c7   : > { %v3978_v3 = vpop.eup %3259 }
 0x1c8   : > { %4940 = vst [vmem:[#allocation22_spill] sm:$0xff] %v3978_v3  ;;  %v3980_v15 = vpop.eup %3261  ;;  %2616 = vmatprep.mubr.f32.mxu1 %v3978_v3  ;;  %v872_v3 = vld [vmem:[#allocation2 + $0x1e8] sm:$0xff]  ;;  %3002 = vmatprep.subr.bf16.mxu1 %v3001_v49 }
 0x1c9   : > { %4941 = vst [vmem:[#allocation23_spill] sm:$0xff] %v3980_v15  ;;  %2617 = vmatmul.mubr.f32.gmra.mrb[10].mxu1 %v3980_v15  ;;  %v2993_v53 = vpack.c.bf16 %v872_v3, %v871_v58  ;;  %v1083_v58 = vld [vmem:[#allocation2 + $0x230] sm:$0xff]  ;;  %v1085_v3 = vld [vmem:[#allocation2 + $0x240] sm:$0xff] }
 0x1ca   : > { %3004 = vmatpush3.bf16.msra.mxu1 %v3001_v49  ;;  %v609_v49 = vadd.f32 %v3885_v47, %v3763_v5 }
 0x1cb   : > { %v3984_v44 = vpop.eup %3263  ;;  %2994 = vmatprep.subr.bf16.mxu0 %v2993_v53 }
 0x1cc   : > { %4942 = vst [vmem:[#allocation24_spill] sm:$0xff] %v3984_v44  ;;  %v3986_v27 = vpop.eup %3265  ;;  %2619 = vmatprep.mubr.f32.mxu1 %v3984_v44  ;;  %2996 = vmatpush3.bf16.msra.mxu0 %v2993_v53  ;;  %v873_v44 = vld [vmem:[#allocation2 + $0x1f0] sm:$0xff]  ;;  %v3013_v53 = vpack.c.bf16 %v1084_v60, %v1083_v58  ;;  %v611_v58 = vadd.f32 %v3893_v1, %v3767_v8 }
 0x1cd   : > { %4943 = vst [vmem:[#allocation25_spill] sm:$0xff] %v3986_v27  ;;  %2620 = vmatmul.mubr.f32.gmra.mrb[12].mxu1 %v3986_v27  ;;  %v874_v27 = vld [vmem:[#allocation2 + $0x1f8] sm:$0xff]  ;;  %v610_v60 = vadd.f32 %v3896_v4, %v3757_v2 }
 0x1ce   : > { %v2997_v15 = vpack.c.bf16 %v874_v27, %v873_v44  ;;  %v1086_v44 = vld [vmem:[#allocation2 + $0x248] sm:$0xff] }
 0x1cf   : > { %v3990_v55 = vpop.eup %3267 }
 0x1d0   : > { %4944 = vst [vmem:[#allocation26_spill] sm:$0xff] %v3990_v55  ;;  %v3992_v54 = vpop.eup %3269  ;;  %2622 = vmatprep.mubr.f32.mxu1 %v3990_v55  ;;  %2998 = vmatprep.subr.bf16.mxu0 %v2997_v15  ;;  %v1079_v55 = vld [vmem:[#allocation2 + $0x210] sm:$0xff] }
 0x1d1   : > { %4945 = vst [vmem:[#allocation27_spill] sm:$0xff] %v3992_v54  ;;  %2623 = vmatmul.mubr.f32.gmra.mrb[14].mxu1 %v3992_v54  ;;  %3000 = vmatpush3.bf16.msra.mxu0 %v2997_v15  ;;  %v1080_v54 = vld [vmem:[#allocation2 + $0x218] sm:$0xff]  ;;  %v3017_v15 = vpack.c.bf16 %v1086_v44, %v1085_v3  ;;  %v613_v44 = vadd.f32 %v3901_v7, %v3777_v14 }
 0x1d2   : > { %v3005_v22 = vpack.c.bf16 %v1080_v54, %v1079_v55  ;;  %v3999_v54 = vld [vmem:[%s4896_s2 + $0x2] ss:$0 sm:$0xff]  ;;  %v624_v14 = vadd.f32 %v3911_v16, %v3785_v18  ;;  %v615_v7 = vadd.f32 %v3909_v13, %v3789_v21  ;;  %v627_v18 = vadd.f32 %v3930_v31, %v3811_v32 }
 0x1d4   : > { %3006 = vmatprep.subr.bf16.mxu1 %v3005_v22 }
 0x1d5   : > { %3008 = vmatpush3.bf16.msra.mxu1 %v3005_v22  ;;  %v608_v22 = vadd.f32 %v3888_v62, %v3754_v63 }
 0x1d6   : > { %3010 = vmatprep.subr.bf16.mxu1 %v3009_v57 }
 0x1d9   : > { %3012 = vmatpush3.bf16.msra.mxu1 %v3009_v57 }
 0x1da   : > { %3014 = vmatprep.subr.bf16.mxu1 %v3013_v53 }
 0x1dd   : > { %3016 = vmatpush3.bf16.msra.mxu1 %v3013_v53 }
 0x1de   : > { %3018 = vmatprep.subr.bf16.mxu1 %v3017_v15 }
 0x1e1   : > { %3020 = vmatpush3.bf16.msra.mxu1 %v3017_v15  ;;  %v612_v15 = vadd.f32 %v3904_v10, %v3773_v11 }
 0x288   : > { %v2603_v55 = vpop.f32.mrb[0].mxu1 }
 0x289   : > { %v737_v51 = vadd.f32 %v2603_v55, %v3999_v54  ;;  %v731_v56 = vpop.f32.mrb[1].mxu1  ;;  %v625_v55 = vadd.f32 %v3916_v20, %v3800_v26 }
 0x28a   : > { %v732_v38 = vadd.f32 %v3999_v54, %v731_v56 }
 0x28b   : > { %3271 = vtanh.f32 %v737_v51  ;;  %v4007_v27 = vadd.f32 %v737_v51, %v609_v49 }
 0x28c   : > { %3273 = vtanh.f32 %v732_v38  ;;  %v4009_v59 = vadd.f32 %v732_v38, %v608_v22  ;;  %v2606_v57 = vpop.f32.mrb[2].mxu1  ;;  %v614_v38 = vadd.f32 %v3914_v19, %v3783_v17  ;;  %v626_v17 = vadd.f32 %v3925_v28, %v3795_v24 }
 0x28d   : > { %v747_v5 = vadd.f32 %v2606_v57, %v3999_v54  ;;  %v741_v47 = vpop.f32.mrb[3].mxu1  ;;  %v617_v19 = vadd.f32 %v3923_v23, %v3804_v29  ;;  %v629_v24 = vadd.f32 %v3944_v46, %v3827_v40 }
 0x28e   : > { %v742_v63 = vadd.f32 %v3999_v54, %v741_v47 }
 0x28f   : > { %3275 = vtanh.f32 %v747_v5  ;;  %v4017_v62 = vadd.f32 %v747_v5, %v611_v58 }
 0x290   : > { %3277 = vtanh.f32 %v742_v63  ;;  %v4019_v53 = vadd.f32 %v742_v63, %v610_v60  ;;  %v2609_v3 = vpop.f32.mrb[4].mxu1  ;;  %v616_v63 = vadd.f32 %v3928_v30, %v3798_v25  ;;  %v628_v25 = vadd.f32 %v3939_v39, %v3816_v34 }
 0x291   : > { %v757_v8 = vadd.f32 %v2609_v3, %v3999_v54  ;;  %v751_v1 = vpop.f32.mrb[5].mxu1  ;;  %v619_v30 = vadd.f32 %v3937_v36, %v3820_v37  ;;  %v631_v34 = vadd.f32 %v3958_v12, %v3843_v48 }
 0x292   : > { %v752_v2 = vadd.f32 %v3999_v54, %v751_v1 }
 0x293   : > { %3279 = vtanh.f32 %v757_v8  ;;  %v4027_v4 = vadd.f32 %v757_v8, %v613_v44 }
 0x294   : > { %3281 = vtanh.f32 %v752_v2  ;;  %v4031_v49 = vadd.f32 %v752_v2, %v612_v15  ;;  %v2612_v51 = vpop.f32.mrb[6].mxu1  ;;  %v618_v2 = vadd.f32 %v3942_v43, %v3814_v33  ;;  %v630_v33 = vadd.f32 %v3953_v6, %v3832_v42 }
 0x295   : > { %v3272_v56 = vpop.eup %3271  ;;  %v767_v11 = vadd.f32 %v2612_v51, %v3999_v54  ;;  %v761_v10 = vpop.f32.mrb[7].mxu1  ;;  %v621_v43 = vadd.f32 %v3951_v0, %v3836_v45  ;;  %v633_v42 = vadd.f32 %v3972_v61, %v3857_v52 }
 0x296   : > { %v3274_v22 = vpop.eup %3273  ;;  %v4040_v57 = vadd.f32 %v3272_v56, %v625_v55  ;;  %v762_v26 = vadd.f32 %v3999_v54, %v761_v10 }
 0x297   : > { %v4043_v20 = vadd.f32 %v3274_v22, %v624_v14  ;;  %3283 = vtanh.f32 %v767_v11  ;;  %v4045_v58 = vadd.f32 %v767_v11, %v615_v7  ;;  %2657 = vmatprep.mubr.f32.mxu0 %v3274_v22  ;;  %v620_v11 = vadd.f32 %v3956_v9, %v3830_v41  ;;  %v4946_v9 = vld [vmem:[#allocation13_spill] sm:$0xff] }
 0x298   : > { %3285 = vtanh.f32 %v762_v26  ;;  %v4049_v21 = vadd.f32 %v762_v26, %v614_v38  ;;  %v2615_v13 = vpop.f32.mrb[8].mxu1  ;;  %2658 = vmatmul.mubr.f32.vlgmr.msra.gmra.mrb[16].mxu0 %v3272_v56  ;;  %v632_v41 = vadd.f32 %v3967_v35, %v3848_v50  ;;  %v4947_v38 = vld [vmem:[#allocation20_spill] sm:$0xff]  ;;  %v4950_v50 = vld [vmem:[#allocation15_spill] sm:$0xff] }
 0x299   : > { %v3276_v16 = vpop.eup %3275  ;;  %v777_v5 = vadd.f32 %v2615_v13, %v3999_v54  ;;  %v771_v47 = vpop.f32.mrb[9].mxu1  ;;  %v623_v26 = vadd.f32 %v4947_v38, %v4946_v9  ;;  %v4951_v35 = vld [vmem:[#allocation23_spill] sm:$0xff] }
 0x29a   : > { %v3278_v60 = vpop.eup %3277  ;;  %v4058_v32 = vadd.f32 %v3276_v16, %v627_v18  ;;  %v772_v31 = vadd.f32 %v3999_v54, %v771_v47 }
 0x29b   : > { %v4061_v3 = vadd.f32 %v3278_v60, %v626_v17  ;;  %3287 = vtanh.f32 %v777_v5  ;;  %v4063_v44 = vadd.f32 %v777_v5, %v617_v19  ;;  %2660 = vmatprep.mubr.f32.mxu0 %v3278_v60  ;;  %v4948_v17 = vld [vmem:[#allocation12_spill] sm:$0xff]  ;;  %v4949_v19 = vld [vmem:[#allocation21_spill] sm:$0xff] }
 0x29c   : > { %3289 = vtanh.f32 %v772_v31  ;;  %v4067_v29 = vadd.f32 %v772_v31, %v616_v63  ;;  %v2618_v23 = vpop.f32.mrb[10].mxu1  ;;  %2661 = vmatmul.mubr.f32.gmra.mrb[18].mxu0 %v3276_v16  ;;  %v622_v5 = vadd.f32 %v4949_v19, %v4948_v17  ;;  %v635_v63 = vadd.f32 %v4951_v35, %v4950_v50  ;;  %v1090_v17 = vld [vmem:[#allocation2 + $0x268] sm:$0xff]  ;;  %v1295_v35 = vld [vmem:[#allocation2 + $0x280] sm:$0xff] }
 0x29d   : > { %v3280_v28 = vpop.eup %3279  ;;  %v787_v8 = vadd.f32 %v2618_v23, %v3999_v54  ;;  %v781_v1 = vpop.f32.mrb[11].mxu1  ;;  %v4952_v23 = vld [vmem:[#allocation14_spill] sm:$0xff] }
 0x29e   : > { %v3282_v15 = vpop.eup %3281  ;;  %v4076_v40 = vadd.f32 %v3280_v28, %v629_v24  ;;  %v782_v46 = vadd.f32 %v3999_v54, %v781_v1  ;;  %v4954_v1 = vld [vmem:[#allocation17_spill] sm:$0xff] }
 0x29f   : > { %v4079_v55 = vadd.f32 %v3282_v15, %v628_v25  ;;  %3291 = vtanh.f32 %v787_v8  ;;  %v4081_v51 = vadd.f32 %v787_v8, %v619_v30  ;;  %2663 = vmatprep.mubr.f32.mxu0 %v3282_v15  ;;  %v4955_v15 = vld [vmem:[#allocation25_spill] sm:$0xff] }
 0x2a0   : > { %3293 = vtanh.f32 %v782_v46  ;;  %v4085_v37 = vadd.f32 %v782_v46, %v618_v2  ;;  %v2621_v36 = vpop.f32.mrb[12].mxu1  ;;  %2664 = vmatmul.mubr.f32.gmra.mrb[20].mxu0 %v3280_v28  ;;  %v4953_v28 = vld [vmem:[#allocation22_spill] sm:$0xff]  ;;  %v637_v2 = vadd.f32 %v4955_v15, %v4954_v1  ;;  %v1300_v1 = vld [vmem:[#allocation2 + $0x2a8] sm:$0xff] }
 0x2a1   : > { %v3284_v39 = vpop.eup %3283  ;;  %v797_v56 = vadd.f32 %v2621_v36, %v3999_v54  ;;  %v791_v14 = vpop.f32.mrb[13].mxu1  ;;  %v634_v25 = vadd.f32 %v4953_v28, %v4952_v23  ;;  %v4957_v36 = vld [vmem:[#allocation24_spill] sm:$0xff]  ;;  %v1298_v28 = vld [vmem:[#allocation2 + $0x298] sm:$0xff] }
 0x2a2   : > { %v3286_v7 = vpop.eup %3285  ;;  %v4094_v48 = vadd.f32 %v3284_v39, %v631_v34  ;;  %v792_v12 = vadd.f32 %v3999_v54, %v791_v14  ;;  %v4956_v34 = vld [vmem:[#allocation16_spill] sm:$0xff]  ;;  %v4958_v14 = vld [vmem:[#allocation19_spill] sm:$0xff] }
 0x2a3   : > { %v4097_v10 = vadd.f32 %v3286_v7, %v630_v33  ;;  %3295 = vtanh.f32 %v797_v56  ;;  %v4099_v22 = vadd.f32 %v797_v56, %v621_v43  ;;  %2666 = vmatprep.mubr.f32.mxu0 %v3286_v7  ;;  %v4959_v7 = vld [vmem:[#allocation27_spill] sm:$0xff] }
 0x2a4   : > { %3297 = vtanh.f32 %v792_v12  ;;  %v4103_v45 = vadd.f32 %v792_v12, %v620_v11  ;;  %v2624_v0 = vpop.f32.mrb[14].mxu1  ;;  %2667 = vmatmul.mubr.f32.gmra.mrb[22].mxu0 %v3284_v39  ;;  %v636_v39 = vadd.f32 %v4957_v36, %v4956_v34  ;;  %v639_v11 = vadd.f32 %v4959_v7, %v4958_v14  ;;  %v1303_v36 = vld [vmem:[#allocation2 + $0x2c0] sm:$0xff]  ;;  %v4148_v14 = vld [vmem:[%s4896_s2 + $0x3] ss:$0 sm:$0xff] }
 0x2a5   : > { %v3288_v6 = vpop.eup %3287  ;;  %v807_v18 = vadd.f32 %v2624_v0, %v3999_v54  ;;  %v801_v13 = vpop.f32.mrb[15].mxu1  ;;  %v4961_v0 = vld [vmem:[#allocation26_spill] sm:$0xff] }
 0x2a6   : > { %v3290_v16 = vpop.eup %3289  ;;  %v4112_v52 = vadd.f32 %v3288_v6, %v633_v42  ;;  %v802_v61 = vadd.f32 %v3999_v54, %v801_v13  ;;  %v4960_v42 = vld [vmem:[#allocation18_spill] sm:$0xff] }
 0x2a7   : > { %v4115_v47 = vadd.f32 %v3290_v16, %v632_v41  ;;  %3299 = vtanh.f32 %v807_v18  ;;  %v4117_v60 = vadd.f32 %v807_v18, %v623_v26  ;;  %2669 = vmatprep.mubr.f32.mxu0 %v3290_v16  ;;  %v1087_v26 = vld [vmem:[#allocation2 + $0x250] sm:$0xff]  ;;  %v1088_v18 = vld [vmem:[#allocation2 + $0x258] sm:$0xff]  ;;  %v1089_v16 = vld [vmem:[#allocation2 + $0x260] sm:$0xff] }
 0x2a8   : > { %3301 = vtanh.f32 %v802_v61  ;;  %v4121_v31 = vadd.f32 %v802_v61, %v622_v5  ;;  %2670 = vmatmul.mubr.f32.gmra.mrb[24].mxu0 %v3288_v6  ;;  %v638_v6 = vadd.f32 %v4961_v0, %v4960_v42  ;;  %v3021_v13 = vpack.c.bf16 %v1088_v18, %v1087_v26  ;;  %v1091_v5 = vld [vmem:[#allocation2 + $0x270] sm:$0xff]  ;;  %v1092_v61 = vld [vmem:[#allocation2 + $0x278] sm:$0xff] }
 0x2a9   : > { %v3292_v24 = vpop.eup %3291  ;;  %v3025_v19 = vpack.c.bf16 %v1090_v17, %v1089_v16  ;;  %v3029_v50 = vpack.c.bf16 %v1092_v61, %v1091_v5 }
 0x2aa   : > { %v3294_v30 = vpop.eup %3293  ;;  %v4125_v8 = vadd.f32 %v3292_v24, %v635_v63  ;;  %3022 = vmatprep.subr.bf16.mxu1 %v3021_v13  ;;  %v1296_v63 = vld [vmem:[#allocation2 + $0x288] sm:$0xff] }
 0x2ab   : > { %v4127_v54 = vadd.f32 %v3294_v30, %v634_v25  ;;  %2672 = vmatprep.mubr.f32.mxu0 %v3294_v30  ;;  %3024 = vmatpush3.bf16.msra.mxu1 %v3021_v13  ;;  %v3033_v23 = vpack.c.bf16 %v1296_v63, %v1295_v35  ;;  %v1299_v30 = vld [vmem:[#allocation2 + $0x2a0] sm:$0xff] }
 0x2ac   : > { %2673 = vmatmul.mubr.f32.gmra.mrb[26].mxu0 %v3292_v24  ;;  %3026 = vmatprep.subr.bf16.mxu1 %v3025_v19  ;;  %v1297_v24 = vld [vmem:[#allocation2 + $0x290] sm:$0xff]  ;;  %v3041_v15 = vpack.c.bf16 %v1300_v1, %v1299_v30 }
 0x2ad   : > { %v3296_v46 = vpop.eup %3295  ;;  %v3037_v25 = vpack.c.bf16 %v1298_v28, %v1297_v24  ;;  %3034 = vmatprep.subr.bf16.mxu0 %v3033_v23 }
 0x2ae   : > { %v3298_v33 = vpop.eup %3297  ;;  %v4133_v43 = vadd.f32 %v3296_v46, %v637_v2  ;;  %3036 = vmatpush3.bf16.msra.mxu0 %v3033_v23  ;;  %v1301_v2 = vld [vmem:[#allocation2 + $0x2b0] sm:$0xff] }
 0x2af   : > { %v4135_v56 = vadd.f32 %v3298_v33, %v636_v39  ;;  %2675 = vmatprep.mubr.f32.mxu0 %v3298_v33  ;;  %3028 = vmatpush3.bf16.msra.mxu1 %v3025_v19  ;;  %v1304_v39 = vld [vmem:[#allocation2 + $0x2c8] sm:$0xff] }
 0x2b0   : > { %2676 = vmatmul.mubr.f32.gmra.mrb[28].mxu0 %v3296_v46  ;;  %3030 = vmatprep.subr.bf16.mxu1 %v3029_v50  ;;  %v1302_v46 = vld [vmem:[#allocation2 + $0x2b8] sm:$0xff]  ;;  %v3049_v33 = vpack.c.bf16 %v1304_v39, %v1303_v36 }
 0x2b1   : > { %v3300_v12 = vpop.eup %3299  ;;  %3038 = vmatprep.subr.bf16.mxu0 %v3037_v25  ;;  %v3045_v34 = vpack.c.bf16 %v1302_v46, %v1301_v2 }
 0x2b2   : > { %v3302_v41 = vpop.eup %3301  ;;  %v4141_v9 = vadd.f32 %v3300_v12, %v639_v11  ;;  %3040 = vmatpush3.bf16.msra.mxu0 %v3037_v25 }
 0x2b3   : > { %v4143_v38 = vadd.f32 %v3302_v41, %v638_v6  ;;  %2678 = vmatprep.mubr.f32.mxu0 %v3302_v41  ;;  %3032 = vmatpush3.bf16.msra.mxu1 %v3029_v50 }
 0x2b4   : > { %2679 = vmatmul.mubr.f32.gmra.mrb[30].mxu0 %v3300_v12  ;;  %3042 = vmatprep.subr.bf16.mxu0 %v3041_v15 }
 0x2b6   : > { %3044 = vmatpush3.bf16.msra.mxu0 %v3041_v15 }
 0x2b7   : > { %3046 = vmatprep.subr.bf16.mxu0 %v3045_v34 }
 0x2ba   : > { %3048 = vmatpush3.bf16.msra.mxu0 %v3045_v34 }
 0x2bb   : > { %3050 = vmatprep.subr.bf16.mxu0 %v3049_v33 }
 0x2be   : > { %3052 = vmatpush3.bf16.msra.mxu0 %v3049_v33 }
 0x36b   : > { %v2659_v7 = vpop.f32.mrb[16].mxu0 }
 0x36c   : > { %v955_v11 = vadd.f32 %v2659_v7, %v4148_v14  ;;  %v949_v12 = vpop.f32.mrb[17].mxu0 }
 0x36d   : > { %v950_v42 = vadd.f32 %v4148_v14, %v949_v12 }
 0x36e   : > { %3303 = vtanh.f32 %v955_v11  ;;  %v4153_v0 = vadd.f32 %v955_v11, %v4007_v27 }
 0x36f   : > { %3305 = vtanh.f32 %v950_v42  ;;  %v4156_v6 = vadd.f32 %v950_v42, %v4009_v59  ;;  %v2662_v41 = vpop.f32.mrb[18].mxu0 }
 0x370   : > { %v965_v26 = vadd.f32 %v2662_v41, %v4148_v14  ;;  %v959_v18 = vpop.f32.mrb[19].mxu0 }
 0x371   : > { %v960_v13 = vadd.f32 %v4148_v14, %v959_v18 }
 0x372   : > { %3307 = vtanh.f32 %v965_v26  ;;  %v4161_v16 = vadd.f32 %v965_v26, %v4017_v62 }
 0x373   : > { %3309 = vtanh.f32 %v960_v13  ;;  %v4164_v17 = vadd.f32 %v960_v13, %v4019_v53  ;;  %v2665_v27 = vpop.f32.mrb[20].mxu0 }
 0x374   : > { %v975_v19 = vadd.f32 %v2665_v27, %v4148_v14  ;;  %v969_v5 = vpop.f32.mrb[21].mxu0 }
 0x375   : > { %v970_v59 = vadd.f32 %v4148_v14, %v969_v5 }
 0x376   : > { %3311 = vtanh.f32 %v975_v19  ;;  %v4169_v61 = vadd.f32 %v975_v19, %v4027_v4 }
 0x377   : > { %3313 = vtanh.f32 %v970_v59  ;;  %v4172_v50 = vadd.f32 %v970_v59, %v4031_v49  ;;  %v2668_v62 = vpop.f32.mrb[22].mxu0 }
 0x378   : > { %v3304_v35 = vpop.eup %3303  ;;  %v985_v63 = vadd.f32 %v2668_v62, %v4148_v14  ;;  %v979_v53 = vpop.f32.mrb[23].mxu0 }
 0x379   : > { %v3306_v24 = vpop.eup %3305  ;;  %v4176_v23 = vadd.f32 %v3304_v35, %v4040_v57  ;;  %v980_v28 = vadd.f32 %v4148_v14, %v979_v53 }
 0x37a   : > { %v4180_v25 = vadd.f32 %v3306_v24, %v4043_v20  ;;  %3315 = vtanh.f32 %v985_v63  ;;  %v4183_v4 = vadd.f32 %v985_v63, %v4045_v58  ;;  %2713 = vmatprep.mubr.f32.mxu1 %v3306_v24 }
 0x37b   : > { %3317 = vtanh.f32 %v980_v28  ;;  %v4186_v49 = vadd.f32 %v980_v28, %v4049_v21  ;;  %v2671_v30 = vpop.f32.mrb[24].mxu0  ;;  %2714 = vmatmul.mubr.f32.vlgmr.msra.gmra.mrb[16].mxu1 %v3304_v35 }
 0x37c   : > { %v3308_v1 = vpop.eup %3307  ;;  %v995_v57 = vadd.f32 %v2671_v30, %v4148_v14  ;;  %v989_v15 = vpop.f32.mrb[25].mxu0 }
 0x37d   : > { %v3310_v2 = vpop.eup %3309  ;;  %v4190_v46 = vadd.f32 %v3308_v1, %v4058_v32  ;;  %v990_v20 = vadd.f32 %v4148_v14, %v989_v15  ;;  %v1306_v15 = vld [vmem:[#allocation2 + $0x2d8] sm:$0xff] }
 0x37e   : > { %v4194_v58 = vadd.f32 %v3310_v2, %v4061_v3  ;;  %3319 = vtanh.f32 %v995_v57  ;;  %v4197_v34 = vadd.f32 %v995_v57, %v4063_v44  ;;  %2716 = vmatprep.mubr.f32.mxu1 %v3310_v2  ;;  %v1305_v57 = vld [vmem:[#allocation2 + $0x2d0] sm:$0xff] }
 0x37f   : > { %3321 = vtanh.f32 %v990_v20  ;;  %v4200_v21 = vadd.f32 %v990_v20, %v4067_v29  ;;  %v2674_v36 = vpop.f32.mrb[26].mxu0  ;;  %2717 = vmatmul.mubr.f32.gmra.mrb[18].mxu1 %v3308_v1  ;;  %v3053_v2 = vpack.c.bf16 %v1306_v15, %v1305_v57 }
 0x380   : > { %v3312_v39 = vpop.eup %3311  ;;  %v1005_v32 = vadd.f32 %v2674_v36, %v4148_v14  ;;  %v999_v33 = vpop.f32.mrb[27].mxu0  ;;  %v1309_v36 = vld [vmem:[#allocation2 + $0x2f0] sm:$0xff] }
 0x381   : > { %v3314_v7 = vpop.eup %3313  ;;  %v4204_v11 = vadd.f32 %v3312_v39, %v4076_v40  ;;  %v1000_v3 = vadd.f32 %v4148_v14, %v999_v33  ;;  %3054 = vmatprep.subr.bf16.mxu0 %v3053_v2  ;;  %v1515_v33 = vld [vmem:[#allocation2 + $0x310] sm:$0xff] }
 0x382   : > { %v4208_v44 = vadd.f32 %v3314_v7, %v4079_v55  ;;  %3323 = vtanh.f32 %v1005_v32  ;;  %v4211_v12 = vadd.f32 %v1005_v32, %v4081_v51  ;;  %2719 = vmatprep.mubr.f32.mxu1 %v3314_v7  ;;  %3056 = vmatpush3.bf16.msra.mxu0 %v3053_v2 }
 0x383   : > { %3325 = vtanh.f32 %v1000_v3  ;;  %v4214_v29 = vadd.f32 %v1000_v3, %v4085_v37  ;;  %v2677_v42 = vpop.f32.mrb[28].mxu0  ;;  %2720 = vmatmul.mubr.f32.gmra.mrb[20].mxu1 %v3312_v39  ;;  %v1310_v39 = vld [vmem:[#allocation2 + $0x2f8] sm:$0xff] }
 0x384   : > { %v3316_v41 = vpop.eup %3315  ;;  %v1015_v40 = vadd.f32 %v2677_v42, %v4148_v14  ;;  %v1009_v26 = vpop.f32.mrb[29].mxu0  ;;  %v3061_v32 = vpack.c.bf16 %v1310_v39, %v1309_v36  ;;  %v1516_v3 = vld [vmem:[#allocation2 + $0x318] sm:$0xff] }
 0x385   : > { %v3318_v18 = vpop.eup %3317  ;;  %v4218_v13 = vadd.f32 %v3316_v41, %v4094_v48  ;;  %v1010_v55 = vadd.f32 %v4148_v14, %v1009_v26  ;;  %v3069_v42 = vpack.c.bf16 %v1516_v3, %v1515_v33 }
 0x386   : > { %v4222_v51 = vadd.f32 %v3318_v18, %v4097_v10  ;;  %3327 = vtanh.f32 %v1015_v40  ;;  %v4225_v27 = vadd.f32 %v1015_v40, %v4099_v22  ;;  %2722 = vmatprep.mubr.f32.mxu1 %v3318_v18  ;;  %v1518_v40 = vld [vmem:[#allocation2 + $0x328] sm:$0xff]  ;;  %v1519_v18 = vld [vmem:[#allocation2 + $0x330] sm:$0xff] }
 0x387   : > { %3329 = vtanh.f32 %v1010_v55  ;;  %v4228_v37 = vadd.f32 %v1010_v55, %v4103_v45  ;;  %v2680_v19 = vpop.f32.mrb[30].mxu0  ;;  %2723 = vmatmul.mubr.f32.gmra.mrb[22].mxu1 %v3316_v41  ;;  %v1517_v41 = vld [vmem:[#allocation2 + $0x320] sm:$0xff]  ;;  %v1520_v55 = vld [vmem:[#allocation2 + $0x338] sm:$0xff] }
 0x388   : > { %v3320_v5 = vpop.eup %3319  ;;  %v1025_v48 = vadd.f32 %v2680_v19, %v4148_v14  ;;  %v1019_v59 = vpop.f32.mrb[31].mxu0  ;;  %v3073_v26 = vpack.c.bf16 %v1518_v40, %v1517_v41  ;;  %v3077_v19 = vpack.c.bf16 %v1520_v55, %v1519_v18 }
 0x389   : > { %v3322_v62 = vpop.eup %3321  ;;  %v4232_v35 = vadd.f32 %v3320_v5, %v4112_v52  ;;  %v1020_v10 = vadd.f32 %v4148_v14, %v1019_v59 }
 0x38a   : > { %v4236_v22 = vadd.f32 %v3322_v62, %v4115_v47  ;;  %3331 = vtanh.f32 %v1025_v48  ;;  %v4239_v63 = vadd.f32 %v1025_v48, %v4117_v60  ;;  %2725 = vmatprep.mubr.f32.mxu1 %v3322_v62  ;;  %v1522_v48 = vld [vmem:[#allocation2 + $0x348] sm:$0xff]  ;;  %v4265_v62 = vld [vmem:[%s4896_s2 + $0x4] ss:$0 sm:$0xff] }
 0x38b   : > { %3333 = vtanh.f32 %v1020_v10  ;;  %v4242_v45 = vadd.f32 %v1020_v10, %v4121_v31  ;;  %2726 = vmatmul.mubr.f32.gmra.mrb[24].mxu1 %v3320_v5  ;;  %v1521_v5 = vld [vmem:[#allocation2 + $0x340] sm:$0xff] }
 0x38c   : > { %v3324_v53 = vpop.eup %3323  ;;  %v3081_v59 = vpack.c.bf16 %v1522_v48, %v1521_v5 }
 0x38d   : > { %v3326_v24 = vpop.eup %3325  ;;  %v4245_v52 = vadd.f32 %v3324_v53, %v4125_v8 }
 0x38e   : > { %v4248_v14 = vadd.f32 %v3326_v24, %v4127_v54  ;;  %2728 = vmatprep.mubr.f32.mxu1 %v3326_v24 }
 0x38f   : > { %2729 = vmatmul.mubr.f32.gmra.mrb[26].mxu1 %v3324_v53 }
 0x390   : > { %v3328_v47 = vpop.eup %3327 }
 0x391   : > { %v3330_v28 = vpop.eup %3329  ;;  %v4251_v60 = vadd.f32 %v3328_v47, %v4133_v43  ;;  %v1307_v43 = vld [vmem:[#allocation2 + $0x2e0] sm:$0xff] }
 0x392   : > { %v4254_v30 = vadd.f32 %v3330_v28, %v4135_v56  ;;  %2731 = vmatprep.mubr.f32.mxu1 %v3330_v28  ;;  %v1308_v56 = vld [vmem:[#allocation2 + $0x2e8] sm:$0xff] }
 0x393   : > { %2732 = vmatmul.mubr.f32.gmra.mrb[28].mxu1 %v3328_v47  ;;  %v3057_v20 = vpack.c.bf16 %v1308_v56, %v1307_v43 }
 0x394   : > { %v3332_v31 = vpop.eup %3331 }
 0x395   : > { %v3334_v1 = vpop.eup %3333  ;;  %v4257_v8 = vadd.f32 %v3332_v31, %v4141_v9  ;;  %3058 = vmatprep.subr.bf16.mxu0 %v3057_v20  ;;  %v1513_v9 = vld [vmem:[#allocation2 + $0x300] sm:$0xff] }
 0x396   : > { %v4260_v54 = vadd.f32 %v3334_v1, %v4143_v38  ;;  %2734 = vmatprep.mubr.f32.mxu1 %v3334_v1  ;;  %3060 = vmatpush3.bf16.msra.mxu0 %v3057_v20  ;;  %v1514_v38 = vld [vmem:[#allocation2 + $0x308] sm:$0xff] }
 0x397   : > { %2735 = vmatmul.mubr.f32.gmra.mrb[30].mxu1 %v3332_v31  ;;  %3062 = vmatprep.subr.bf16.mxu0 %v3061_v32  ;;  %v3065_v7 = vpack.c.bf16 %v1514_v38, %v1513_v9 }
 0x399   : > { %3066 = vmatprep.subr.bf16.mxu1 %v3065_v7 }
 0x39a   : > { %3064 = vmatpush3.bf16.msra.mxu0 %v3061_v32  ;;  %3068 = vmatpush3.bf16.msra.mxu1 %v3065_v7 }
 0x39b   : > { %3070 = vmatprep.subr.bf16.mxu1 %v3069_v42 }
 0x39e   : > { %3072 = vmatpush3.bf16.msra.mxu1 %v3069_v42 }
 0x39f   : > { %3074 = vmatprep.subr.bf16.mxu1 %v3073_v26 }
 0x3a2   : > { %3076 = vmatpush3.bf16.msra.mxu1 %v3073_v26 }
 0x3a3   : > { %3078 = vmatprep.subr.bf16.mxu1 %v3077_v19 }
 0x3a6   : > { %3080 = vmatpush3.bf16.msra.mxu1 %v3077_v19 }
 0x3a7   : > { %3082 = vmatprep.subr.bf16.mxu1 %v3081_v59 }
 0x3aa   : > { %3084 = vmatpush3.bf16.msra.mxu1 %v3081_v59 }
 0x44e   : > { %v2715_v10 = vpop.f32.mrb[16].mxu1 }
 0x44f   : > { %v1173_v53 = vadd.f32 %v2715_v10, %v4265_v62  ;;  %v1167_v24 = vpop.f32.mrb[17].mxu1 }
 0x450   : > { %v1168_v47 = vadd.f32 %v4265_v62, %v1167_v24 }
 0x451   : > { %3335 = vtanh.f32 %v1173_v53  ;;  %v4270_v28 = vadd.f32 %v1173_v53, %v4153_v0 }
 0x452   : > { %3337 = vtanh.f32 %v1168_v47  ;;  %v4273_v31 = vadd.f32 %v1168_v47, %v4156_v6  ;;  %v2718_v1 = vpop.f32.mrb[18].mxu1 }
 0x453   : > { %v1183_v57 = vadd.f32 %v2718_v1, %v4265_v62  ;;  %v1177_v15 = vpop.f32.mrb[19].mxu1 }
 0x454   : > { %v1178_v2 = vadd.f32 %v4265_v62, %v1177_v15 }
 0x455   : > { %3339 = vtanh.f32 %v1183_v57  ;;  %v4278_v43 = vadd.f32 %v1183_v57, %v4161_v16 }
 0x456   : > { %3341 = vtanh.f32 %v1178_v2  ;;  %v4281_v56 = vadd.f32 %v1178_v2, %v4164_v17  ;;  %v2721_v0 = vpop.f32.mrb[20].mxu1 }
 0x457   : > { %v1193_v20 = vadd.f32 %v2721_v0, %v4265_v62  ;;  %v1187_v36 = vpop.f32.mrb[21].mxu1 }
 0x458   : > { %v1188_v6 = vadd.f32 %v4265_v62, %v1187_v36 }
 0x459   : > { %3343 = vtanh.f32 %v1193_v20  ;;  %v4286_v39 = vadd.f32 %v1193_v20, %v4169_v61 }
 0x45a   : > { %3345 = vtanh.f32 %v1188_v6  ;;  %v4289_v32 = vadd.f32 %v1188_v6, %v4172_v50  ;;  %v2724_v16 = vpop.f32.mrb[22].mxu1 }
 0x45b   : > { %v3336_v9 = vpop.eup %3335  ;;  %v1203_v38 = vadd.f32 %v2724_v16, %v4265_v62  ;;  %v1197_v17 = vpop.f32.mrb[23].mxu1 }
 0x45c   : > { %v3338_v33 = vpop.eup %3337  ;;  %v4293_v7 = vadd.f32 %v3336_v9, %v4176_v23  ;;  %v1198_v3 = vadd.f32 %v4265_v62, %v1197_v17 }
 0x45d   : > { %v4297_v42 = vadd.f32 %v3338_v33, %v4180_v25  ;;  %3347 = vtanh.f32 %v1203_v38  ;;  %v4300_v61 = vadd.f32 %v1203_v38, %v4183_v4  ;;  %2769 = vmatprep.mubr.f32.mxu0 %v3338_v33 }
 0x45e   : > { %3349 = vtanh.f32 %v1198_v3  ;;  %v4303_v50 = vadd.f32 %v1198_v3, %v4186_v49  ;;  %v2727_v41 = vpop.f32.mrb[24].mxu1  ;;  %2770 = vmatmul.mubr.f32.vlgmr.msra.gmra.mrb[32].mxu0 %v3336_v9 }
 0x45f   : > { %v3340_v40 = vpop.eup %3339  ;;  %v1213_v23 = vadd.f32 %v2727_v41, %v4265_v62  ;;  %v1207_v26 = vpop.f32.mrb[25].mxu1 }
 0x460   : > { %v3342_v18 = vpop.eup %3341  ;;  %v4307_v55 = vadd.f32 %v3340_v40, %v4190_v46  ;;  %v1208_v25 = vadd.f32 %v4265_v62, %v1207_v26  ;;  %v1524_v26 = vld [vmem:[#allocation2 + $0x358] sm:$0xff] }
 0x461   : > { %v4311_v4 = vadd.f32 %v3342_v18, %v4194_v58  ;;  %3351 = vtanh.f32 %v1213_v23  ;;  %v4314_v19 = vadd.f32 %v1213_v23, %v4197_v34  ;;  %2772 = vmatprep.mubr.f32.mxu0 %v3342_v18  ;;  %v1523_v23 = vld [vmem:[#allocation2 + $0x350] sm:$0xff] }
 0x462   : > { %3353 = vtanh.f32 %v1208_v25  ;;  %v4317_v49 = vadd.f32 %v1208_v25, %v4200_v21  ;;  %v2730_v5 = vpop.f32.mrb[26].mxu1  ;;  %2773 = vmatmul.mubr.f32.gmra.mrb[34].mxu0 %v3340_v40  ;;  %v3085_v18 = vpack.c.bf16 %v1524_v26, %v1523_v23 }
 0x463   : > { %v3344_v48 = vpop.eup %3343  ;;  %v1223_v46 = vadd.f32 %v2730_v5, %v4265_v62  ;;  %v1217_v59 = vpop.f32.mrb[27].mxu1  ;;  %v1527_v5 = vld [vmem:[#allocation2 + $0x370] sm:$0xff] }
 0x464   : > { %v3346_v10 = vpop.eup %3345  ;;  %v4321_v53 = vadd.f32 %v3344_v48, %v4204_v11  ;;  %v1218_v58 = vadd.f32 %v4265_v62, %v1217_v59  ;;  %3086 = vmatprep.subr.bf16.mxu1 %v3085_v18  ;;  %v1733_v59 = vld [vmem:[#allocation2 + $0x390] sm:$0xff] }
 0x465   : > { %v4325_v34 = vadd.f32 %v3346_v10, %v4208_v44  ;;  %3355 = vtanh.f32 %v1223_v46  ;;  %v4328_v24 = vadd.f32 %v1223_v46, %v4211_v12  ;;  %2775 = vmatprep.mubr.f32.mxu0 %v3346_v10  ;;  %3088 = vmatpush3.bf16.msra.mxu1 %v3085_v18 }
 0x466   : > { %3357 = vtanh.f32 %v1218_v58  ;;  %v4331_v21 = vadd.f32 %v1218_v58, %v4214_v29  ;;  %v2733_v47 = vpop.f32.mrb[28].mxu1  ;;  %2776 = vmatmul.mubr.f32.gmra.mrb[36].mxu0 %v3344_v48  ;;  %v1528_v48 = vld [vmem:[#allocation2 + $0x378] sm:$0xff] }
 0x467   : > { %v3348_v1 = vpop.eup %3347  ;;  %v1233_v11 = vadd.f32 %v2733_v47, %v4265_v62  ;;  %v1227_v57 = vpop.f32.mrb[29].mxu1  ;;  %v3093_v46 = vpack.c.bf16 %v1528_v48, %v1527_v5  ;;  %v1734_v58 = vld [vmem:[#allocation2 + $0x398] sm:$0xff] }
 0x468   : > { %v3350_v15 = vpop.eup %3349  ;;  %v4335_v2 = vadd.f32 %v3348_v1, %v4218_v13  ;;  %v1228_v44 = vadd.f32 %v4265_v62, %v1227_v57  ;;  %v4381_v47 = vpack.c.bf16 %v1734_v58, %v1733_v59 }
 0x469   : > { %v4339_v12 = vadd.f32 %v3350_v15, %v4222_v51  ;;  %3359 = vtanh.f32 %v1233_v11  ;;  %v4342_v0 = vadd.f32 %v1233_v11, %v4225_v27  ;;  %2778 = vmatprep.mubr.f32.mxu0 %v3350_v15  ;;  %v1736_v11 = vld [vmem:[#allocation2 + $0x3a8] sm:$0xff]  ;;  %v1737_v15 = vld [vmem:[#allocation2 + $0x3b0] sm:$0xff] }
 0x46a   : > { %3361 = vtanh.f32 %v1228_v44  ;;  %v4345_v29 = vadd.f32 %v1228_v44, %v4228_v37  ;;  %v2736_v20 = vpop.f32.mrb[30].mxu1  ;;  %2779 = vmatmul.mubr.f32.gmra.mrb[38].mxu0 %v3348_v1  ;;  %v1735_v1 = vld [vmem:[#allocation2 + $0x3a0] sm:$0xff]  ;;  %v1738_v44 = vld [vmem:[#allocation2 + $0x3b8] sm:$0xff] }
 0x46b   : > { %v3352_v36 = vpop.eup %3351  ;;  %v1243_v13 = vadd.f32 %v2736_v20, %v4265_v62  ;;  %v1237_v6 = vpop.f32.mrb[31].mxu1  ;;  %v4387_v57 = vpack.c.bf16 %v1736_v11, %v1735_v1  ;;  %v4391_v20 = vpack.c.bf16 %v1738_v44, %v1737_v15 }
 0x46c   : > { %v3354_v16 = vpop.eup %3353  ;;  %v4349_v9 = vadd.f32 %v3352_v36, %v4232_v35  ;;  %v1238_v51 = vadd.f32 %v4265_v62, %v1237_v6 }
 0x46d   : > { %v4353_v27 = vadd.f32 %v3354_v16, %v4236_v22  ;;  %3363 = vtanh.f32 %v1243_v13  ;;  %v4356_v38 = vadd.f32 %v1243_v13, %v4239_v63  ;;  %2781 = vmatprep.mubr.f32.mxu0 %v3354_v16  ;;  %v1740_v13 = vld [vmem:[#allocation2 + $0x3c8] sm:$0xff]  ;;  %v4403_v16 = vld [vmem:[%s4896_s2 + $0x5] ss:$0 sm:$0xff] }
 0x46e   : > { %3365 = vtanh.f32 %v1238_v51  ;;  %v4359_v37 = vadd.f32 %v1238_v51, %v4242_v45  ;;  %2782 = vmatmul.mubr.f32.gmra.mrb[40].mxu0 %v3352_v36  ;;  %v1739_v36 = vld [vmem:[#allocation2 + $0x3c0] sm:$0xff] }
 0x46f   : > { %v3356_v17 = vpop.eup %3355  ;;  %v4395_v6 = vpack.c.bf16 %v1740_v13, %v1739_v36 }
 0x470   : > { %v3358_v33 = vpop.eup %3357  ;;  %v4362_v35 = vadd.f32 %v3356_v17, %v4245_v52 }
 0x471   : > { %v4365_v62 = vadd.f32 %v3358_v33, %v4248_v14  ;;  %2784 = vmatprep.mubr.f32.mxu0 %v3358_v33 }
 0x472   : > { %2785 = vmatmul.mubr.f32.gmra.mrb[42].mxu0 %v3356_v17 }
 0x473   : > { %v3360_v22 = vpop.eup %3359 }
 0x474   : > { %v3362_v3 = vpop.eup %3361  ;;  %v4368_v63 = vadd.f32 %v3360_v22, %v4251_v60  ;;  %v1525_v60 = vld [vmem:[#allocation2 + $0x360] sm:$0xff] }
 0x475   : > { %v4371_v41 = vadd.f32 %v3362_v3, %v4254_v30  ;;  %2787 = vmatprep.mubr.f32.mxu0 %v3362_v3  ;;  %v1526_v30 = vld [vmem:[#allocation2 + $0x368] sm:$0xff] }
 0x476   : > { %2788 = vmatmul.mubr.f32.gmra.mrb[44].mxu0 %v3360_v22  ;;  %v3089_v25 = vpack.c.bf16 %v1526_v30, %v1525_v60 }
 0x477   : > { %v3364_v45 = vpop.eup %3363 }
 0x478   : > { %v3366_v40 = vpop.eup %3365  ;;  %v4374_v52 = vadd.f32 %v3364_v45, %v4257_v8  ;;  %3090 = vmatprep.subr.bf16.mxu1 %v3089_v25  ;;  %v1731_v8 = vld [vmem:[#allocation2 + $0x380] sm:$0xff] }
 0x479   : > { %v4377_v14 = vadd.f32 %v3366_v40, %v4260_v54  ;;  %2790 = vmatprep.mubr.f32.mxu0 %v3366_v40  ;;  %3092 = vmatpush3.bf16.msra.mxu1 %v3089_v25  ;;  %v1732_v54 = vld [vmem:[#allocation2 + $0x388] sm:$0xff] }
 0x47a   : > { %2791 = vmatmul.mubr.f32.gmra.mrb[46].mxu0 %v3364_v45  ;;  %3094 = vmatprep.subr.bf16.mxu1 %v3093_v46  ;;  %v4379_v10 = vpack.c.bf16 %v1732_v54, %v1731_v8 }
 0x47c   : > { %3098 = vmatprep.subr.bf16.mxu0 %v4379_v10 }
 0x47d   : > { %3096 = vmatpush3.bf16.msra.mxu1 %v3093_v46  ;;  %3100 = vmatpush3.bf16.msra.mxu0 %v4379_v10 }
 0x47e   : > { %3129 = vmatprep.subr.bf16.mxu1 %v4379_v10  ;;  %3102 = vmatprep.subr.bf16.mxu0 %v4381_v47 }
 0x481   : > { %3104 = vmatpush3.bf16.msra.mxu0 %v4381_v47 }
 0x482   : > { %3106 = vmatprep.subr.bf16.mxu0 %v4387_v57 }
 0x485   : > { %3108 = vmatpush3.bf16.msra.mxu0 %v4387_v57 }
 0x486   : > { %3110 = vmatprep.subr.bf16.mxu0 %v4391_v20 }
 0x489   : > { %3112 = vmatpush3.bf16.msra.mxu0 %v4391_v20 }
 0x48a   : > { %3114 = vmatprep.subr.bf16.mxu0 %v4395_v6 }
 0x48d   : > { %3116 = vmatpush3.bf16.msra.mxu0 %v4395_v6 }
 0x531   : > { %v2771_v51 = vpop.f32.mrb[32].mxu0 }
 0x532   : > { %v1391_v17 = vadd.f32 %v2771_v51, %v4403_v16  ;;  %v1385_v33 = vpop.f32.mrb[33].mxu0 }
 0x533   : > { %v1386_v22 = vadd.f32 %v4403_v16, %v1385_v33 }
 0x534   : > { %3367 = vtanh.f32 %v1391_v17  ;;  %v4408_v3 = vadd.f32 %v1391_v17, %v4270_v28 }
 0x535   : > { %3369 = vtanh.f32 %v1386_v22  ;;  %v4411_v45 = vadd.f32 %v1386_v22, %v4273_v31  ;;  %v2774_v40 = vpop.f32.mrb[34].mxu0 }
 0x536   : > { %v1401_v23 = vadd.f32 %v2774_v40, %v4403_v16  ;;  %v1395_v26 = vpop.f32.mrb[35].mxu0 }
 0x537   : > { %v1396_v18 = vadd.f32 %v4403_v16, %v1395_v26 }
 0x538   : > { %3371 = vtanh.f32 %v1401_v23  ;;  %v4416_v60 = vadd.f32 %v1401_v23, %v4278_v43 }
 0x539   : > { %3373 = vtanh.f32 %v1396_v18  ;;  %v4419_v30 = vadd.f32 %v1396_v18, %v4281_v56  ;;  %v2777_v28 = vpop.f32.mrb[36].mxu0 }
 0x53a   : > { %v1411_v25 = vadd.f32 %v2777_v28, %v4403_v16  ;;  %v1405_v5 = vpop.f32.mrb[37].mxu0 }
 0x53b   : > { %v1406_v31 = vadd.f32 %v4403_v16, %v1405_v5 }
 0x53c   : > { %3375 = vtanh.f32 %v1411_v25  ;;  %v4424_v48 = vadd.f32 %v1411_v25, %v4286_v39 }
 0x53d   : > { %3377 = vtanh.f32 %v1406_v31  ;;  %v4427_v46 = vadd.f32 %v1406_v31, %v4289_v32  ;;  %v2780_v43 = vpop.f32.mrb[38].mxu0 }
 0x53e   : > { %v3368_v8 = vpop.eup %3367  ;;  %v1421_v54 = vadd.f32 %v2780_v43, %v4403_v16  ;;  %v1415_v56 = vpop.f32.mrb[39].mxu0 }
 0x53f   : > { %v3370_v59 = vpop.eup %3369  ;;  %v4431_v58 = vadd.f32 %v3368_v8, %v4293_v7  ;;  %v1416_v1 = vadd.f32 %v4403_v16, %v1415_v56 }
 0x540   : > { %v4435_v11 = vadd.f32 %v3370_v59, %v4297_v42  ;;  %3379 = vtanh.f32 %v1421_v54  ;;  %v4438_v39 = vadd.f32 %v1421_v54, %v4300_v61  ;;  %2825 = vmatprep.mubr.f32.mxu1 %v3370_v59 }
 0x541   : > { %3381 = vtanh.f32 %v1416_v1  ;;  %v4441_v32 = vadd.f32 %v1416_v1, %v4303_v50  ;;  %v2783_v15 = vpop.f32.mrb[40].mxu0  ;;  %2826 = vmatmul.mubr.f32.vlgmr.msra.gmra.mrb[32].mxu1 %v3368_v8 }
 0x542   : > { %v3372_v44 = vpop.eup %3371  ;;  %v1431_v7 = vadd.f32 %v2783_v15, %v4403_v16  ;;  %v1425_v36 = vpop.f32.mrb[41].mxu0  ;;  %3137 = vmatpush3.bf16.msra.mxu1 %v4379_v10 }
 0x543   : > { %v3374_v13 = vpop.eup %3373  ;;  %v4446_v42 = vadd.f32 %v3372_v44, %v4307_v55  ;;  %v1426_v61 = vadd.f32 %v4403_v16, %v1425_v36  ;;  %3130 = vmatprep.subr.bf16.mxu1 %v4381_v47  ;;  %v1742_v36 = vld [vmem:[#allocation2 + $0x3d8] sm:$0xff] }
 0x544   : > { %v4451_v51 = vadd.f32 %v3374_v13, %v4311_v4  ;;  %3383 = vtanh.f32 %v1431_v7  ;;  %v4454_v50 = vadd.f32 %v1431_v7, %v4314_v19  ;;  %2828 = vmatprep.mubr.f32.mxu1 %v3374_v13  ;;  %v1741_v7 = vld [vmem:[#allocation2 + $0x3d0] sm:$0xff] }
 0x545   : > { %3385 = vtanh.f32 %v1426_v61  ;;  %v4457_v17 = vadd.f32 %v1426_v61, %v4317_v49  ;;  %v2786_v10 = vpop.f32.mrb[42].mxu0  ;;  %2829 = vmatmul.mubr.f32.gmra.mrb[34].mxu1 %v3372_v44  ;;  %v3117_v13 = vpack.c.bf16 %v1742_v36, %v1741_v7 }
 0x546   : > { %v3376_v55 = vpop.eup %3375  ;;  %v1441_v33 = vadd.f32 %v2786_v10, %v4403_v16  ;;  %v1435_v22 = vpop.f32.mrb[43].mxu0  ;;  %3138 = vmatpush3.bf16.msra.mxu1 %v4381_v47  ;;  %v1746_v10 = vld [vmem:[#allocation2 + $0x3f8] sm:$0xff] }
 0x547   : > { %v3378_v40 = vpop.eup %3377  ;;  %v4462_v4 = vadd.f32 %v3376_v55, %v4321_v53  ;;  %v1436_v19 = vadd.f32 %v4403_v16, %v1435_v22  ;;  %3131 = vmatprep.subr.bf16.mxu1 %v4387_v57  ;;  %3118 = vmatprep.subr.bf16.mxu0 %v3117_v13 }
 0x548   : > { %v4467_v23 = vadd.f32 %v3378_v40, %v4325_v34  ;;  %3387 = vtanh.f32 %v1441_v33  ;;  %v4470_v49 = vadd.f32 %v1441_v33, %v4328_v24  ;;  %2831 = vmatprep.mubr.f32.mxu1 %v3378_v40  ;;  %3120 = vmatpush3.bf16.msra.mxu0 %v3117_v13 }
 0x549   : > { %3389 = vtanh.f32 %v1436_v19  ;;  %v4473_v26 = vadd.f32 %v1436_v19, %v4331_v21  ;;  %v2789_v47 = vpop.f32.mrb[44].mxu0  ;;  %2832 = vmatmul.mubr.f32.gmra.mrb[36].mxu1 %v3376_v55  ;;  %v4529_v55 = vld [vmem:[%s4896_s2 + $0x6] ss:$0 sm:$0xff] }
 0x54a   : > { %v3380_v53 = vpop.eup %3379  ;;  %v1451_v18 = vadd.f32 %v2789_v47, %v4403_v16  ;;  %v1445_v28 = vpop.f32.mrb[45].mxu0  ;;  %3139 = vmatpush3.bf16.msra.mxu1 %v4387_v57 }
 0x54b   : > { %v3382_v25 = vpop.eup %3381  ;;  %v4478_v34 = vadd.f32 %v3380_v53, %v4335_v2  ;;  %v1446_v24 = vadd.f32 %v4403_v16, %v1445_v28  ;;  %3132 = vmatprep.subr.bf16.mxu1 %v4391_v20 }
 0x54c   : > { %v4483_v5 = vadd.f32 %v3382_v25, %v4339_v12  ;;  %3391 = vtanh.f32 %v1451_v18  ;;  %v4486_v21 = vadd.f32 %v1451_v18, %v4342_v0  ;;  %2834 = vmatprep.mubr.f32.mxu1 %v3382_v25 }
 0x54d   : > { %3393 = vtanh.f32 %v1446_v24  ;;  %v4489_v31 = vadd.f32 %v1446_v24, %v4345_v29  ;;  %v2792_v57 = vpop.f32.mrb[46].mxu0  ;;  %2835 = vmatmul.mubr.f32.gmra.mrb[38].mxu1 %v3380_v53 }
 0x54e   : > { %v3384_v2 = vpop.eup %3383  ;;  %v1461_v43 = vadd.f32 %v2792_v57, %v4403_v16  ;;  %v1455_v8 = vpop.f32.mrb[47].mxu0  ;;  %3140 = vmatpush3.bf16.msra.mxu1 %v4391_v20 }
 0x54f   : > { %v3386_v54 = vpop.eup %3385  ;;  %v4494_v12 = vadd.f32 %v3384_v2, %v4349_v9  ;;  %v1456_v0 = vadd.f32 %v4403_v16, %v1455_v8  ;;  %3133 = vmatprep.subr.bf16.mxu1 %v4395_v6 }
 0x550   : > { %v4499_v56 = vadd.f32 %v3386_v54, %v4353_v27  ;;  %3395 = vtanh.f32 %v1461_v43  ;;  %v4502_v29 = vadd.f32 %v1461_v43, %v4356_v38  ;;  %2837 = vmatprep.mubr.f32.mxu1 %v3386_v54 }
 0x551   : > { %3397 = vtanh.f32 %v1456_v0  ;;  %v4505_v59 = vadd.f32 %v1456_v0, %v4359_v37  ;;  %2838 = vmatmul.mubr.f32.gmra.mrb[40].mxu1 %v3384_v2 }
 0x552   : > { %v3388_v20 = vpop.eup %3387  ;;  %3141 = vmatpush3.bf16.msra.mxu1 %v4395_v6 }
 0x553   : > { %v3390_v9 = vpop.eup %3389  ;;  %v4509_v16 = vadd.f32 %v3388_v20, %v4362_v35  ;;  %3134 = vmatprep.subr.bf16.mxu1 %v3117_v13 }
 0x554   : > { %v4512_v27 = vadd.f32 %v3390_v9, %v4365_v62  ;;  %2840 = vmatprep.mubr.f32.mxu1 %v3390_v9 }
 0x555   : > { %2841 = vmatmul.mubr.f32.gmra.mrb[42].mxu1 %v3388_v20 }
 0x556   : > { %v3392_v38 = vpop.eup %3391  ;;  %3142 = vmatpush3.bf16.msra.mxu1 %v3117_v13 }
 0x557   : > { %v3394_v1 = vpop.eup %3393  ;;  %v4515_v15 = vadd.f32 %v3392_v38, %v4368_v63  ;;  %v1743_v63 = vld [vmem:[#allocation2 + $0x3e0] sm:$0xff] }
 0x558   : > { %v4518_v37 = vadd.f32 %v3394_v1, %v4371_v41  ;;  %2843 = vmatprep.mubr.f32.mxu1 %v3394_v1  ;;  %v1744_v41 = vld [vmem:[#allocation2 + $0x3e8] sm:$0xff] }
 0x559   : > { %2844 = vmatmul.mubr.f32.gmra.mrb[44].mxu1 %v3392_v38  ;;  %v3121_v61 = vpack.c.bf16 %v1744_v41, %v1743_v63 }
 0x55a   : > { %v3396_v6 = vpop.eup %3395 }
 0x55b   : > { %v3398_v44 = vpop.eup %3397  ;;  %v4521_v35 = vadd.f32 %v3396_v6, %v4374_v52  ;;  %3122 = vmatprep.subr.bf16.mxu0 %v3121_v61  ;;  %3135 = vmatprep.subr.bf16.mxu1 %v3121_v61  ;;  %v1745_v52 = vld [vmem:[#allocation2 + $0x3f0] sm:$0xff] }
 0x55c   : > { %v4524_v62 = vadd.f32 %v3398_v44, %v4377_v14  ;;  %2846 = vmatprep.mubr.f32.mxu1 %v3398_v44  ;;  %3124 = vmatpush3.bf16.msra.mxu0 %v3121_v61  ;;  %v3125_v14 = vpack.c.bf16 %v1746_v10, %v1745_v52 }
 0x55d   : > { %2847 = vmatmul.mubr.f32.gmra.mrb[46].mxu1 %v3396_v6 }
 0x55e   : > { %3143 = vmatpush3.bf16.msra.mxu1 %v3121_v61  ;;  %3126 = vmatprep.subr.bf16.mxu0 %v3125_v14 }
 0x55f   : > { %3136 = vmatprep.subr.bf16.mxu1 %v3125_v14 }
 0x560   : > { %3128 = vmatpush3.bf16.msra.mxu0 %v3125_v14 }
 0x562   : > { %3144 = vmatpush3.bf16.msra.mxu1 %v3125_v14 }
 0x614   : > { %v2827_v33 = vpop.f32.mrb[32].mxu1 }
 0x615   : > { %v1609_v22 = vadd.f32 %v2827_v33, %v4529_v55  ;;  %v1603_v40 = vpop.f32.mrb[33].mxu1 }
 0x616   : > { %v1604_v19 = vadd.f32 %v4529_v55, %v1603_v40 }
 0x617   : > { %3399 = vtanh.f32 %v1609_v22  ;;  %v4534_v47 = vadd.f32 %v1609_v22, %v4408_v3 }
 0x618   : > { %3401 = vtanh.f32 %v1604_v19  ;;  %v4537_v53 = vadd.f32 %v1604_v19, %v4411_v45  ;;  %v2830_v18 = vpop.f32.mrb[34].mxu1 }
 0x619   : > { %v1619_v28 = vadd.f32 %v2830_v18, %v4529_v55  ;;  %v1613_v25 = vpop.f32.mrb[35].mxu1 }
 0x61a   : > { %v1614_v24 = vadd.f32 %v4529_v55, %v1613_v25 }
 0x61b   : > { %3403 = vtanh.f32 %v1619_v28  ;;  %v4542_v57 = vadd.f32 %v1619_v28, %v4416_v60 }
 0x61c   : > { %3405 = vtanh.f32 %v1614_v24  ;;  %v4545_v2 = vadd.f32 %v1614_v24, %v4419_v30  ;;  %v2833_v3 = vpop.f32.mrb[36].mxu1 }
 0x61d   : > { %v1629_v43 = vadd.f32 %v2833_v3, %v4529_v55  ;;  %v1623_v8 = vpop.f32.mrb[37].mxu1 }
 0x61e   : > { %v1624_v45 = vadd.f32 %v4529_v55, %v1623_v8 }
 0x61f   : > { %3407 = vtanh.f32 %v1629_v43  ;;  %v4550_v54 = vadd.f32 %v1629_v43, %v4424_v48 }
 0x620   : > { %3409 = vtanh.f32 %v1624_v45  ;;  %v4553_v0 = vadd.f32 %v1624_v45, %v4427_v46  ;;  %v2836_v60 = vpop.f32.mrb[38].mxu1 }
 0x621   : > { %v3400_v20 = vpop.eup %3399  ;;  %v1639_v9 = vadd.f32 %v2836_v60, %v4529_v55  ;;  %v1633_v30 = vpop.f32.mrb[39].mxu1 }
 0x622   : > { %v3402_v38 = vpop.eup %3401  ;;  %v4557_v1 = vadd.f32 %v3400_v20, %v4431_v58  ;;  %v1634_v6 = vadd.f32 %v4529_v55, %v1633_v30 }
 0x623   : > { %v4561_v44 = vadd.f32 %v3402_v38, %v4435_v11  ;;  %3411 = vtanh.f32 %v1639_v9  ;;  %v4564_v48 = vadd.f32 %v1639_v9, %v4438_v39  ;;  %2881 = vmatprep.mubr.f32.mxu0 %v3402_v38 }
 0x624   : > { %3413 = vtanh.f32 %v1634_v6  ;;  %v4567_v46 = vadd.f32 %v1634_v6, %v4441_v32  ;;  %v2839_v7 = vpop.f32.mrb[40].mxu1  ;;  %2882 = vmatmul.mubr.f32.vlgmr.msra.gmra.mrb[48].mxu0 %v3400_v20 }
 0x625   : > { %v3404_v36 = vpop.eup %3403  ;;  %v1649_v58 = vadd.f32 %v2839_v7, %v4529_v55  ;;  %v1643_v13 = vpop.f32.mrb[41].mxu1 }
 0x626   : > { %v3406_v63 = vpop.eup %3405  ;;  %v4571_v41 = vadd.f32 %v3404_v36, %v4446_v42  ;;  %v1644_v11 = vadd.f32 %v4529_v55, %v1643_v13 }
 0x627   : > { %v4575_v39 = vadd.f32 %v3406_v63, %v4451_v51  ;;  %3415 = vtanh.f32 %v1649_v58  ;;  %v4578_v61 = vadd.f32 %v1649_v58, %v4454_v50  ;;  %2884 = vmatprep.mubr.f32.mxu0 %v3406_v63 }
 0x628   : > { %3417 = vtanh.f32 %v1644_v11  ;;  %v4581_v32 = vadd.f32 %v1644_v11, %v4457_v17  ;;  %v2842_v52 = vpop.f32.mrb[42].mxu1  ;;  %2885 = vmatmul.mubr.f32.gmra.mrb[50].mxu0 %v3404_v36 }
 0x629   : > { %v3408_v10 = vpop.eup %3407  ;;  %v1659_v42 = vadd.f32 %v2842_v52, %v4529_v55  ;;  %v1653_v14 = vpop.f32.mrb[43].mxu1 }
 0x62a   : > { %v3410_v33 = vpop.eup %3409  ;;  %v4585_v22 = vadd.f32 %v3408_v10, %v4462_v4  ;;  %v1654_v51 = vadd.f32 %v4529_v55, %v1653_v14  ;;  %v1981_v14 = vld [vmem:[#allocation2 + $0x400] sm:$0xff] }
 0x62b   : > { %v4589_v50 = vadd.f32 %v3410_v33, %v4467_v23  ;;  %3419 = vtanh.f32 %v1659_v42  ;;  %v4592_v40 = vadd.f32 %v1659_v42, %v4470_v49  ;;  %2887 = vmatprep.mubr.f32.mxu0 %v3410_v33 }
 0x62c   : > { %3421 = vtanh.f32 %v1654_v51  ;;  %v4595_v17 = vadd.f32 %v1654_v51, %v4473_v26  ;;  %v2845_v19 = vpop.f32.mrb[44].mxu1  ;;  %2888 = vmatmul.mubr.f32.gmra.mrb[52].mxu0 %v3408_v10 }
 0x62d   : > { %v3412_v18 = vpop.eup %3411  ;;  %v1669_v4 = vadd.f32 %v2845_v19, %v4529_v55  ;;  %v1663_v28 = vpop.f32.mrb[45].mxu1 }
 0x62e   : > { %v3414_v25 = vpop.eup %3413  ;;  %v4599_v24 = vadd.f32 %v3412_v18, %v4478_v34  ;;  %v1664_v23 = vadd.f32 %v4529_v55, %v1663_v28 }
 0x62f   : > { %v4603_v49 = vadd.f32 %v3414_v25, %v4483_v5  ;;  %3423 = vtanh.f32 %v1669_v4  ;;  %v4606_v3 = vadd.f32 %v1669_v4, %v4486_v21  ;;  %2890 = vmatprep.mubr.f32.mxu0 %v3414_v25  ;;  %v4962_v4 = vld [vmem:[#allocation11_spill] sm:$0xff] }
 0x630   : > { %3425 = vtanh.f32 %v1664_v23  ;;  %v4609_v26 = vadd.f32 %v1664_v23, %v4489_v31  ;;  %v2848_v43 = vpop.f32.mrb[46].mxu1  ;;  %2891 = vmatmul.mubr.f32.gmra.mrb[54].mxu0 %v3412_v18  ;;  %v4963_v28 = vsub.s32 0, %v4962_v4 }
 0x631   : > { %v3416_v8 = vpop.eup %3415  ;;  %v1679_v34 = vadd.f32 %v2848_v43, %v4529_v55  ;;  %v1673_v45 = vpop.f32.mrb[47].mxu1 }
 0x632   : > { %v3418_v60 = vpop.eup %3417  ;;  %v4613_v20 = vadd.f32 %v3416_v8, %v4494_v12  ;;  %v1674_v5 = vadd.f32 %v4529_v55, %v1673_v45  ;;  %v4672_v25 = vrot.slane %v1981_v14, %v4963_v28 }
 0x633   : > { %v4617_v21 = vadd.f32 %v3418_v60, %v4499_v56  ;;  %3427 = vtanh.f32 %v1679_v34  ;;  %v4620_v9 = vadd.f32 %v1679_v34, %v4502_v29  ;;  %2893 = vmatprep.mubr.f32.mxu1 %v3418_v60 }
 0x634   : > { %3429 = vtanh.f32 %v1674_v5  ;;  %v4623_v31 = vadd.f32 %v1674_v5, %v4505_v59  ;;  %2894 = vmatmul.mubr.f32.vlgmr.msra.gmra.mrb[48].mxu1 %v3416_v8 }
 0x635   : > { %v3420_v30 = vpop.eup %3419 }
 0x636   : > { %v3422_v38 = vpop.eup %3421  ;;  %v4626_v12 = vadd.f32 %v3420_v30, %v4509_v16 }
 0x637   : > { %v4629_v55 = vadd.f32 %v3422_v38, %v4512_v27  ;;  %2896 = vmatprep.mubr.f32.mxu1 %v3422_v38 }
 0x638   : > { %2897 = vmatmul.mubr.f32.gmra.mrb[50].mxu1 %v3420_v30 }
 0x639   : > { %v3424_v56 = vpop.eup %3423 }
 0x63a   : > { %v3426_v29 = vpop.eup %3425  ;;  %v4632_v6 = vadd.f32 %v3424_v56, %v4515_v15  ;;  %v4649_v15 = vld [vmem:[%s4896_s2 + $0x7] ss:$0 sm:$0xff] }
 0x63b   : > { %v4635_v59 = vadd.f32 %v3426_v29, %v4518_v37  ;;  %2899 = vmatprep.mubr.f32.mxu1 %v3426_v29 }
 0x63c   : > { %2900 = vmatmul.mubr.f32.gmra.mrb[52].mxu1 %v3424_v56 }
 0x63d   : > { %v3428_v7 = vpop.eup %3427 }
 0x63e   : > { %v3430_v36 = vpop.eup %3429  ;;  %v4638_v16 = vadd.f32 %v3428_v7, %v4521_v35 }
 0x63f   : > { %v4641_v27 = vadd.f32 %v3430_v36, %v4524_v62  ;;  %2902 = vmatprep.mubr.f32.mxu1 %v3430_v36 }
 0x640   : > { %2903 = vmatmul.mubr.f32.gmra.mrb[54].mxu1 %v3428_v7 }
 0x6f7   : > { %v2883_v37 = vpop.f32.mrb[48].mxu0 }
 0x6f8   : > { %v1827_v58 = vadd.f32 %v2883_v37, %v4649_v15  ;;  %v1821_v35 = vpop.f32.mrb[49].mxu0 }
 0x6f9   : > { %v1822_v13 = vadd.f32 %v4649_v15, %v1821_v35 }
 0x6fa   : > { %3431 = vtanh.f32 %v1827_v58  ;;  %v1917_v62 = vadd.f32 %v1827_v58, %v4534_v47 }
 0x6fb   : > { %3433 = vtanh.f32 %v1822_v13  ;;  %v1916_v63 = vadd.f32 %v1822_v13, %v4537_v53  ;;  %v2886_v11 = vpop.f32.mrb[50].mxu0 }
 0x6fc   : > { %1949 = vst [vmem:[%s4658_s14 + $0x8] sm:$0xff] %v1917_v62  ;;  %v1837_v52 = vadd.f32 %v2886_v11, %v4649_v15  ;;  %v1831_v10 = vpop.f32.mrb[51].mxu0 }
 0x6fd   : > { %1948 = vst [vmem:[%s4658_s14] sm:$0xff] %v1916_v63  ;;  %v1832_v42 = vadd.f32 %v4649_v15, %v1831_v10 }
 0x6fe   : > { %3435 = vtanh.f32 %v1837_v52  ;;  %v1919_v47 = vadd.f32 %v1837_v52, %v4542_v57 }
 0x6ff   : > { %3437 = vtanh.f32 %v1832_v42  ;;  %v1918_v53 = vadd.f32 %v1832_v42, %v4545_v2  ;;  %v2889_v33 = vpop.f32.mrb[52].mxu0 }
 0x700   : > { %1951 = vst [vmem:[%s4658_s14 + $0x18] sm:$0xff] %v1919_v47  ;;  %v1847_v51 = vadd.f32 %v2889_v33, %v4649_v15  ;;  %v1841_v19 = vpop.f32.mrb[53].mxu0 }
 0x701   : > { %1950 = vst [vmem:[%s4658_s14 + $0x10] sm:$0xff] %v1918_v53  ;;  %v1842_v18 = vadd.f32 %v4649_v15, %v1841_v19 }
 0x702   : > { %3439 = vtanh.f32 %v1847_v51  ;;  %v1921_v57 = vadd.f32 %v1847_v51, %v4550_v54 }
 0x703   : > { %3441 = vtanh.f32 %v1842_v18  ;;  %v1920_v2 = vadd.f32 %v1842_v18, %v4553_v0  ;;  %v2892_v23 = vpop.f32.mrb[54].mxu0 }
 0x704   : > { %v3432_v43 = vpop.eup %3431  ;;  %1953 = vst [vmem:[%s4658_s14 + $0x28] sm:$0xff] %v1921_v57  ;;  %v1857_v8 = vadd.f32 %v2892_v23, %v4649_v15  ;;  %v1851_v34 = vpop.f32.mrb[55].mxu0 }
 0x705   : > { %v3434_v45 = vpop.eup %3433  ;;  %v1933_v60 = vadd.f32 %v3432_v43, %v4557_v1  ;;  %1952 = vst [vmem:[%s4658_s14 + $0x20] sm:$0xff] %v1920_v2  ;;  %v1852_v5 = vadd.f32 %v4649_v15, %v1851_v34  ;;  %v1989_v30 = vmul.f32 %v3432_v43, %v4672_v25 }
 0x706   : > { %v1932_v54 = vadd.f32 %v3434_v45, %v4561_v44  ;;  %3443 = vtanh.f32 %v1857_v8  ;;  %v1923_v0 = vadd.f32 %v1857_v8, %v4564_v48  ;;  %v1988_v38 = vmul.f32 %v3434_v45, %v4672_v25 }
 0x707   : > { %1965 = vst [vmem:[%s4687_s15 + $0x8] sm:$0xff] %v1933_v60  ;;  %3445 = vtanh.f32 %v1852_v5  ;;  %v1922_v1 = vadd.f32 %v1852_v5, %v4567_v46  ;;  %2006 = vadd.xlane.f32.xlu1 %v1989_v30  ;;  %v2895_v56 = vpop.f32.mrb[48].mxu1 }
 0x708   : > { %v3436_v29 = vpop.eup %3435  ;;  %1964 = vst [vmem:[%s4687_s15] sm:$0xff] %v1932_v54  ;;  %1955 = vst [vmem:[%s4658_s14 + $0x38] sm:$0xff] %v1923_v0  ;;  %v1867_v44 = vadd.f32 %v2895_v56, %v4649_v15  ;;  %2004 = vadd.xlane.f32.xlu0 %v1988_v38  ;;  %v1861_v48 = vpop.f32.mrb[49].mxu1 }
 0x709   : > { %v3438_v7 = vpop.eup %3437  ;;  %v1935_v36 = vadd.f32 %v3436_v29, %v4571_v41  ;;  %1954 = vst [vmem:[%s4658_s14 + $0x30] sm:$0xff] %v1922_v1  ;;  %v1862_v37 = vadd.f32 %v4649_v15, %v1861_v48  ;;  %v1991_v46 = vmul.f32 %v3436_v29, %v4672_v25 }
 0x70a   : > { %v1934_v58 = vadd.f32 %v3438_v7, %v4575_v39  ;;  %3447 = vtanh.f32 %v1867_v44  ;;  %v1925_v35 = vadd.f32 %v1867_v44, %v4578_v61  ;;  %v1990_v10 = vmul.f32 %v3438_v7, %v4672_v25 }
 0x70b   : > { %1967 = vst [vmem:[%s4687_s15 + $0x18] sm:$0xff] %v1935_v36  ;;  %3449 = vtanh.f32 %v1862_v37  ;;  %v1924_v13 = vadd.f32 %v1862_v37, %v4581_v32  ;;  %v2898_v62 = vpop.f32.mrb[50].mxu1 }
 0x70c   : > { %v3440_v63 = vpop.eup %3439  ;;  %1966 = vst [vmem:[%s4687_s15 + $0x10] sm:$0xff] %v1934_v58  ;;  %1957 = vst [vmem:[%s4658_s14 + $0x48] sm:$0xff] %v1925_v35  ;;  %v1877_v41 = vadd.f32 %v2898_v62, %v4649_v15  ;;  %2010 = vadd.xlane.f32.xlu0 %v1991_v46  ;;  %v1871_v11 = vpop.f32.mrb[51].mxu1 }
 0x70d   : > { %v3442_v52 = vpop.eup %3441  ;;  %v1937_v39 = vadd.f32 %v3440_v63, %v4585_v22  ;;  %1956 = vst [vmem:[%s4658_s14 + $0x40] sm:$0xff] %v1924_v13  ;;  %v1872_v61 = vadd.f32 %v4649_v15, %v1871_v11 }
 0x70e   : > { %v1936_v32 = vadd.f32 %v3442_v52, %v4589_v50  ;;  %3451 = vtanh.f32 %v1877_v41  ;;  %v1927_v42 = vadd.f32 %v1877_v41, %v4592_v40  ;;  %v1992_v47 = vmul.f32 %v3442_v52, %v4672_v25 }
 0x70f   : > { %1969 = vst [vmem:[%s4687_s15 + $0x28] sm:$0xff] %v1937_v39  ;;  %3453 = vtanh.f32 %v1872_v61  ;;  %v1926_v14 = vadd.f32 %v1872_v61, %v4595_v17  ;;  %v2901_v53 = vpop.f32.mrb[52].mxu1  ;;  %v1993_v17 = vmul.f32 %v3440_v63, %v4672_v25 }
 0x710   : > { %v3444_v33 = vpop.eup %3443  ;;  %1968 = vst [vmem:[%s4687_s15 + $0x20] sm:$0xff] %v1936_v32  ;;  %1959 = vst [vmem:[%s4658_s14 + $0x58] sm:$0xff] %v1927_v42  ;;  %v1887_v22 = vadd.f32 %v2901_v53, %v4649_v15  ;;  %2012 = vadd.xlane.f32.xlu1 %v1992_v47  ;;  %2008 = vadd.xlane.f32.xlu0 %v1990_v10  ;;  %v1881_v50 = vpop.f32.mrb[53].mxu1 }
 0x711   : > { %v3446_v51 = vpop.eup %3445  ;;  %v1939_v40 = vadd.f32 %v3444_v33, %v4599_v24  ;;  %1958 = vst [vmem:[%s4658_s14 + $0x50] sm:$0xff] %v1926_v14  ;;  %v1882_v19 = vadd.f32 %v4649_v15, %v1881_v50 }
 0x712   : > { %v1938_v18 = vadd.f32 %v3446_v51, %v4603_v49  ;;  %3455 = vtanh.f32 %v1887_v22  ;;  %v1929_v4 = vadd.f32 %v1887_v22, %v4606_v3  ;;  %v1994_v28 = vmul.f32 %v3446_v51, %v4672_v25 }
 0x713   : > { %1971 = vst [vmem:[%s4687_s15 + $0x38] sm:$0xff] %v1939_v40  ;;  %3457 = vtanh.f32 %v1882_v19  ;;  %v1928_v57 = vadd.f32 %v1882_v19, %v4609_v26  ;;  %v2904_v2 = vpop.f32.mrb[54].mxu1  ;;  %v1995_v26 = vmul.f32 %v3444_v33, %v4672_v25 }
 0x714   : > { %v3448_v23 = vpop.eup %3447  ;;  %1970 = vst [vmem:[%s4687_s15 + $0x30] sm:$0xff] %v1938_v18  ;;  %1961 = vst [vmem:[%s4658_s14 + $0x68] sm:$0xff] %v1929_v4  ;;  %v1897_v24 = vadd.f32 %v2904_v2, %v4649_v15  ;;  %2016 = vadd.xlane.f32.xlu1 %v1994_v28  ;;  %2014 = vadd.xlane.f32.xlu0 %v1993_v17  ;;  %v1891_v49 = vpop.f32.mrb[55].mxu1 }
 0x715   : > { %v3450_v43 = vpop.eup %3449  ;;  %v1941_v3 = vadd.f32 %v3448_v23, %v4613_v20  ;;  %1960 = vst [vmem:[%s4658_s14 + $0x60] sm:$0xff] %v1928_v57  ;;  %v1892_v8 = vadd.f32 %v4649_v15, %v1891_v49  ;;  %v1997_v30 = vmul.f32 %v3448_v23, %v4672_v25 }
 0x716   : > { %v1940_v34 = vadd.f32 %v3450_v43, %v4617_v21  ;;  %3459 = vtanh.f32 %v1897_v24  ;;  %v1931_v45 = vadd.f32 %v1897_v24, %v4620_v9  ;;  %v1996_v60 = vmul.f32 %v3450_v43, %v4672_v25 }
 0x717   : > { %1973 = vst [vmem:[%s4687_s15 + $0x48] sm:$0xff] %v1941_v3  ;;  %3461 = vtanh.f32 %v1892_v8  ;;  %v1930_v5 = vadd.f32 %v1892_v8, %v4623_v31 }
 0x718   : > { %v3452_v20 = vpop.eup %3451  ;;  %1972 = vst [vmem:[%s4687_s15 + $0x40] sm:$0xff] %v1940_v34  ;;  %1963 = vst [vmem:[%s4658_s14 + $0x78] sm:$0xff] %v1931_v45  ;;  %2018 = vadd.xlane.f32.xlu0 %v1995_v26  ;;  %2020 = vadd.xlane.f32.xlu1 %v1996_v60 }
 0x719   : > { %v3454_v15 = vpop.eup %3453  ;;  %v1943_v21 = vadd.f32 %v3452_v20, %v4626_v12  ;;  %1962 = vst [vmem:[%s4658_s14 + $0x70] sm:$0xff] %v1930_v5  ;;  %v1999_v1 = vmul.f32 %v3452_v20, %v4672_v25 }
 0x71a   : > { %v1942_v9 = vadd.f32 %v3454_v15, %v4629_v55  ;;  %v1998_v54 = vmul.f32 %v3454_v15, %v4672_v25 }
 0x71b   : > { %1975 = vst [vmem:[%s4687_s15 + $0x58] sm:$0xff] %v1943_v21 }
 0x71c   : > { %v3456_v0 = vpop.eup %3455  ;;  %1974 = vst [vmem:[%s4687_s15 + $0x50] sm:$0xff] %v1942_v9  ;;  %2022 = vadd.xlane.f32.xlu0 %v1997_v30  ;;  %2024 = vadd.xlane.f32.xlu1 %v1998_v54 }
 0x71d   : > { %v3458_v31 = vpop.eup %3457  ;;  %v1945_v38 = vadd.f32 %v3456_v0, %v4632_v6 }
 0x71e   : > { %v1944_v12 = vadd.f32 %v3458_v31, %v4635_v59  ;;  %v2000_v55 = vmul.f32 %v3458_v31, %v4672_v25  ;;  %v2001_v59 = vmul.f32 %v3456_v0, %v4672_v25 }
 0x71f   : > { %1977 = vst [vmem:[%s4687_s15 + $0x68] sm:$0xff] %v1945_v38 }
 0x720   : > { %v3460_v56 = vpop.eup %3459  ;;  %1976 = vst [vmem:[%s4687_s15 + $0x60] sm:$0xff] %v1944_v12  ;;  %2026 = vadd.xlane.f32.xlu0 %v1999_v1  ;;  %2028 = vadd.xlane.f32.xlu1 %v2000_v55 }
 0x721   : > { %v3462_v29 = vpop.eup %3461  ;;  %v1947_v44 = vadd.f32 %v3460_v56, %v4638_v16  ;;  %v2003_v7 = vmul.f32 %v3460_v56, %v4672_v25 }
 0x722   : > { %v1946_v6 = vadd.f32 %v3462_v29, %v4641_v27  ;;  %v2002_v48 = vmul.f32 %v3462_v29, %v4672_v25 }
 0x723   : > { %1979 = vst [vmem:[%s4687_s15 + $0x78] sm:$0xff] %v1947_v44 }
 0x724   : > { %1978 = vst [vmem:[%s4687_s15 + $0x70] sm:$0xff] %v1946_v6  ;;  %2030 = vadd.xlane.f32.xlu0 %v2001_v59  ;;  %2032 = vadd.xlane.f32.xlu1 %v2002_v48 }
 0x728   : > { %2034 = vadd.xlane.f32.xlu0 %v2003_v7 }
 0x729   : > { %3504 = shalt.err (!%p3501_p7)
}
 0x72a   : > { %s3505_s13 = scalar_lea.hbm %s4767_s26, 2048  ;;  %s3509_s25 = scalar_lea.hbm %s4898_s4, 8192 }
 0x72b   : > { %p3506_p8 = scmp.ne.s32.totalorder %s4767_s26, %s3505_s13  ;;  %p3510_p1 = scmp.lt.u32.totalorder %s4767_s26, %s4898_s4 }
 0x72c   : > { %p3511_p0 = scmp.lt.u32.totalorder %s3509_s25, %s3505_s13  ;;  %p3513_p6 = scmp.lt.u32.totalorder %s3505_s13, %s4767_s26 }
 0x72d   : > { %p3507_p11 = pnand %p3506_p8, %p4964_p9 }
 0x72e   : > { %p3512_p5 = por %p3511_p0, %p3510_p1 }
 0x72f   : > { %p3508_p13 = pneg %p3507_p11 }
 0x730   : > { %p3514_p10 = por %p3513_p6, %p3512_p5 }
 0x732   : > { %p3515_p12 = pnand %p3514_p10, %p3508_p13 }
 0x734   : > { %3518 = shalt.err (!%p3515_p12)
}
 0x735   : > { %s3596_s8 = smov 128   ;;  %s3597_s12 = smov 8  }
 0x736   : > { %3149 = dma.vmem_to_hbm [thread:$0]  (%p4964_p9), %s4769_s17, 2048, %s4767_s26, %s2081_s30, %s3596_s8, %s3596_s8, %s3597_s12  }
 0x737   : > { %s4803_s23 = scalar_lea.hbm %s4899_s5, %s2287_s16  ;;  %s2119_s25 = sshll.u32 %s4687_s15, 4  ;;  %s4806_s25 = int_to_ptr.vmem [resolvable:$true] %s2119_s25 }
 0x738   : > { %s2086_s9 = scalar_lea.sflag [#allocation7], %s4644_s10  ;;  %s3519_s11 = scalar_lea.vmem %s4806_s25, 2048 }
 0x739   : > { %p3520_p2 = scmp.ne.s32.totalorder %s4806_s25, %s3519_s11  ;;  %s3598_s7 = smov [#allocation6]  }
 0x73a   : > { %s3523_s17 = sshll.u32 %s3598_s7, 4  ;;  %s3524_s17 = int_to_ptr.vmem [resolvable:$false] %s3523_s17 }
 0x73b   : > { %p3521_p3 = pnand %p3520_p2, %p4964_p9  ;;  %s3525_s22 = scalar_lea.vmem %s3524_s17, 4096 }
 0x73c   : > { %p3526_p7 = scmp.lt.s32.totalorder %s4806_s25, %s3524_s17  ;;  %p3527_p8 = scmp.lt.s32.totalorder %s3525_s22, %s3519_s11 }
 0x73d   : > { %p3522_p4 = pneg %p3521_p3 }
 0x73e   : > { %p3528_p11 = por %p3527_p8, %p3526_p7 }
 0x740   : > { %p3529_p13 = pnand %p3528_p11, %p3522_p4 }
 0x742   : > { %3532 = shalt.err (!%p3529_p13)
}
 0x743   : > { %s3533_s15 = scalar_lea.hbm %s4803_s23, 2048  ;;  %s3537_s7 = scalar_lea.hbm %s4899_s5, 8192 }
 0x744   : > { %p3534_p1 = scmp.ne.s32.totalorder %s4803_s23, %s3533_s15  ;;  %p3538_p6 = scmp.lt.u32.totalorder %s4803_s23, %s4899_s5 }
 0x745   : > { %p3539_p10 = scmp.lt.u32.totalorder %s3537_s7, %s3533_s15  ;;  %p3541_p2 = scmp.lt.u32.totalorder %s3533_s15, %s4803_s23 }
 0x746   : > { %p3535_p0 = pnand %p3534_p1, %p4964_p9 }
 0x747   : > { %p3540_p12 = por %p3539_p10, %p3538_p6 }
 0x748   : > { %p3536_p5 = pneg %p3535_p0 }
 0x749   : > { %p3542_p3 = por %p3541_p2, %p3540_p12 }
 0x74b   : > { %p3543_p4 = pnand %p3542_p3, %p3536_p5 }
 0x74d   : > { %3546 = shalt.err (!%p3543_p4)
}
 0x74e   : > { %3150 = dma.vmem_to_hbm [thread:$0]  (%p4964_p9), %s4806_s25, 2048, %s4803_s23, %s2086_s9, %s3596_s8, %s3596_s8, %s3597_s12   ;;  %vm2058_vm0 = vcmask 7168  }
 0x74f   : > { %v2278_v16 = vld [vmem:[%s4896_s2 + $0x8] ss:$0 sm:$0xff]  ;;  %s4965_s17 = sshll.u32 %s4972_s6, 3 }
 0x750   : > { %s4843_s16 = scalar_lea.vmem %s4897_s3, %s4965_s17 }
 0x794   : > { %v2007_v27 = vpop.xlane.xlu1 %2006 }
 0x795   : > { %v2043_v25 = vadd.f32 %v2278_v16, %v2007_v27  ;;  %v2005_v36 = vpop.xlane.xlu0 %2004 }
 0x796   : > { %v2042_v37 = vadd.f32 %v2278_v16, %v2005_v36 }
 0x797   : > { %2060 = vst.msk [vmem:[%s4843_s16 + $0x8] sm:$0xff] %vm2058_vm0, %v2043_v25 }
 0x798   : > { %2059 = vst.msk [vmem:[%s4843_s16] sm:$0xff] %vm2058_vm0, %v2042_v37 }
 0x799   : > { %v2011_v46 = vpop.xlane.xlu0 %2010 }
 0x79a   : > { %v2045_v58 = vadd.f32 %v2278_v16, %v2011_v46 }
 0x79c   : > { %2062 = vst.msk [vmem:[%s4843_s16 + $0x18] sm:$0xff] %vm2058_vm0, %v2045_v58 }
 0x79d   : > { %v2013_v35 = vpop.xlane.xlu1 %2012  ;;  %v2009_v13 = vpop.xlane.xlu0 %2008 }
 0x79e   : > { %v2046_v62 = vadd.f32 %v2278_v16, %v2013_v35  ;;  %v2044_v63 = vadd.f32 %v2278_v16, %v2009_v13 }
 0x7a0   : > { %2063 = vst.msk [vmem:[%s4843_s16 + $0x20] sm:$0xff] %vm2058_vm0, %v2046_v62  ;;  %2061 = vst.msk [vmem:[%s4843_s16 + $0x10] sm:$0xff] %vm2058_vm0, %v2044_v63 }
 0x7a1   : > { %v2017_v41 = vpop.xlane.xlu1 %2016  ;;  %v2015_v11 = vpop.xlane.xlu0 %2014 }
 0x7a2   : > { %v2048_v52 = vadd.f32 %v2278_v16, %v2017_v41  ;;  %v2047_v39 = vadd.f32 %v2278_v16, %v2015_v11 }
 0x7a4   : > { %2065 = vst.msk [vmem:[%s4843_s16 + $0x30] sm:$0xff] %vm2058_vm0, %v2048_v52  ;;  %2064 = vst.msk [vmem:[%s4843_s16 + $0x28] sm:$0xff] %vm2058_vm0, %v2047_v39 }
 0x7a5   : > { %v2019_v61 = vpop.xlane.xlu0 %2018  ;;  %v2021_v10 = vpop.xlane.xlu1 %2020 }
 0x7a6   : > { %v2049_v32 = vadd.f32 %v2278_v16, %v2019_v61  ;;  %v2050_v42 = vadd.f32 %v2278_v16, %v2021_v10 }
 0x7a8   : > { %2066 = vst.msk [vmem:[%s4843_s16 + $0x38] sm:$0xff] %vm2058_vm0, %v2049_v32  ;;  %2067 = vst.msk [vmem:[%s4843_s16 + $0x40] sm:$0xff] %vm2058_vm0, %v2050_v42 }
 0x7a9   : > { %v2023_v47 = vpop.xlane.xlu0 %2022  ;;  %v2025_v14 = vpop.xlane.xlu1 %2024 }
 0x7aa   : > { %v2051_v53 = vadd.f32 %v2278_v16, %v2023_v47  ;;  %v2052_v33 = vadd.f32 %v2278_v16, %v2025_v14 }
 0x7ac   : > { %2068 = vst.msk [vmem:[%s4843_s16 + $0x48] sm:$0xff] %vm2058_vm0, %v2051_v53  ;;  %2069 = vst.msk [vmem:[%s4843_s16 + $0x50] sm:$0xff] %vm2058_vm0, %v2052_v33 }
 0x7ad   : > { %v2027_v22 = vpop.xlane.xlu0 %2026  ;;  %v2029_v50 = vpop.xlane.xlu1 %2028 }
 0x7ae   : > { %v2053_v51 = vadd.f32 %v2278_v16, %v2027_v22  ;;  %v2054_v40 = vadd.f32 %v2278_v16, %v2029_v50 }
 0x7b0   : > { %2070 = vst.msk [vmem:[%s4843_s16 + $0x58] sm:$0xff] %vm2058_vm0, %v2053_v51  ;;  %2071 = vst.msk [vmem:[%s4843_s16 + $0x60] sm:$0xff] %vm2058_vm0, %v2054_v40 }
 0x7b1   : > { %v2031_v19 = vpop.xlane.xlu0 %2030  ;;  %v2033_v17 = vpop.xlane.xlu1 %2032 }
 0x7b2   : > { %v2055_v18 = vadd.f32 %v2278_v16, %v2031_v19  ;;  %v2056_v4 = vadd.f32 %v2278_v16, %v2033_v17 }
 0x7b4   : > { %2072 = vst.msk [vmem:[%s4843_s16 + $0x68] sm:$0xff] %vm2058_vm0, %v2055_v18  ;;  %2073 = vst.msk [vmem:[%s4843_s16 + $0x70] sm:$0xff] %vm2058_vm0, %v2056_v4 }
 0x7b5   : > { %v2035_v28 = vpop.xlane.xlu0 %2034 }
 0x7b6   : > { %v2057_v57 = vadd.f32 %v2278_v16, %v2035_v28 }
 0x7b8   : > { %2074 = vst.msk [vmem:[%s4843_s16 + $0x78] sm:$0xff] %vm2058_vm0, %v2057_v57 }
 0x7b9 PF: > { %p3166_p9 = scmp.ge.s32.totalorder %s3589_s21, 2  ;;  %s2142_s28 = sand.u32 1, %s3577_s18  }
 0x7ba   : > { %p4966_p7 = scmp.ne.s32.totalorder %s4923_s29, 0  ;;  %s2143_s6 = scalar_lea.sflag [#allocation4], %s2142_s28 }
 0x7bc   : > { %p3158_p8 = pnand %p3166_p9, %p4966_p7 }
 0x7be   : > { %3568 = dma.done.wait (!%p3158_p8), %s2143_s6, 2048  }
 0x7bf   : > { %3570 = vsyncadd (!%p3158_p8), %s2143_s6, 4294965248  ;;  %s2152_s10 = scalar_lea.sflag [#allocation7], %s2142_s28 }
 0x7c0   : > { %3572 = dma.done.wait (!%p3158_p8), %s2152_s10, 2048  }
 0x7c1   : > { %3574 = vsyncadd (!%p3158_p8), %s2152_s10, 4294965248  ;;  %p20_p11 = scmp.ge.s32.totalorder %s3654_s24, 6   ;;  %s4967_s18 = smov %s3581_s19 }
 0x7c2   : > { %s4968_s19 = smov %s3585_s20  ;;  %s4969_s20 = smov %s3665_s27 }
 0x7c3   : > { %s4970_s21 = smov %s3654_s24  ;;  %22 = sbr.rel (!%p20_p11) target bundleno = 6 (0x6), region = 117 }
 0x7ca   :  { %2157 = vsyncpa [#allocation3], 1 }
 0x7cb   :  { %2159 = vsyncpa [#allocation3 + $0x1], 1 }
 0x7cc   :  { %2160 = vsyncpa [#allocation4], 1 }
 0x7cd   :  { %2162 = vsyncpa [#allocation4 + $0x1], 1 }
 0x7ce   :  { %2163 = vsyncpa [#allocation7], 1 }
 0x7cf   :  { %2165 = vsyncpa [#allocation7 + $0x1], 1 }

</bundles_post_ra>
